<compile_context>
chip_gen: v7x
topology: tpu7x:2x2x1
jax: 0.10.0
libtpu: 0.0.40
codegen_flags: <defaults>
</compile_context>

<pallas_src>
import functools
import math

import jax
import jax.numpy as jnp
from jax.experimental import pallas as pl
from jax.experimental.pallas import tpu as pltpu


# -----------------------------------------------------------------------------
# Parameter slab packing (host-side, once at init)
# -----------------------------------------------------------------------------

def _round_up(n, m):
    return ((n + m - 1) // m) * m


def _block_diag(mats):
    rows = sum(m.shape[0] for m in mats)
    cols = sum(m.shape[1] for m in mats)
    out = jnp.zeros((rows, cols), jnp.float32)
    r = c = 0
    for m in mats:
        out = out.at[r:r + m.shape[0], c:c + m.shape[1]].set(
            jnp.asarray(m, jnp.float32))
        r += m.shape[0]
        c += m.shape[1]
    return out


class _SlabPacker:
    """Packs many small parameter tensors into one (rows, width) slab.

    Row offsets are sublane-tile aligned (8 rows for f32, 16 for bf16) so
    in-kernel static slices of the slab ref stay layout-friendly. Offsets and
    shapes are plain Python ints (static).
    """

    def __init__(self, width, dtype=jnp.float32, row_align=8):
        self.width = width
        self.dtype = dtype
        self.row_align = row_align
        self.rows = 0
        self.pieces = []
        self.meta = {}

    def add(self, name, arr):
        arr = jnp.asarray(arr, jnp.float32)
        if arr.ndim == 1:
            arr = arr[None, :]
        r, c = arr.shape
        assert c <= self.width, (name, arr.shape, self.width)
        rp = _round_up(r, self.row_align)
        piece = jnp.zeros((rp, self.width), jnp.float32).at[:r, :c].set(arr)
        self.meta[name] = (self.rows, r, c)
        self.pieces.append(piece.astype(self.dtype))
        self.rows += rp

    def finalize(self):
        return jnp.concatenate(self.pieces, axis=0), dict(self.meta)


def pack_params(params, *, n_ts, n_static_feat, n_dynamic_feat, ts_length,
                embed_dim, num_blocks, fcst_h, out_dim,
                param_dtype=jnp.float32):
    """Flattens the parameter pytree into one VMEM-resident slab + static metadata.

    param_dtype=jnp.bfloat16 (together with compute_dtype=jnp.bfloat16 in the
    forward) targets the v6e/v7x bf16 MXU and halves the slab size.
    """
    E, T, L = embed_dim, fcst_h, ts_length
    G = 2 + num_blocks                      # fused s-branches: sx, sz, mlp_s[i]
    width = max(G * E, 3 * E, T, L, out_dim, n_ts, n_dynamic_feat, n_static_feat)
    width = _round_up(width, 128)
    row_align = 8 if jnp.dtype(param_dtype).itemsize >= 4 else 16
    pk = _SlabPacker(width, dtype=param_dtype, row_align=row_align)

    def add_tvec(name, vec):
        # Time-indexed vector, lane-replicated so the kernel can take a leading
        # [:, :C] slice and add it elementwise (no lane broadcasts needed).
        pk.add(name, jnp.tile(jnp.asarray(vec, jnp.float32)[:, None], (1, width)))

    # fc_map: Linear(ts_length -> fcst_h) along time; stored transposed (T, L).
    # The wrapper turns it into a block-diagonal kron(I_bb, fc_wt) per call.
    pk.add("fc/wt", params["fc_map"]["w"].T)
    add_tvec("fc/b", params["fc_map"]["b"])

    # --- fused static-feature branches: [mlp_sx, mlp_sz, block_i.mlp_s ...] ---
    # (block-diag W2 costs (G*E)^2; this fusion targets small/medium E where the
    #  matmul N would otherwise be far below the 128/256-lane MXU width)
    s_br = [params["mlp_sx"], params["mlp_sz"]] \
        + [blk["mlp_s"] for blk in params["mixer_blocks"]]

    def _proj_w(p):
        if "proj" in p:
            return p["proj"]["w"]
        return jnp.eye(n_static_feat, E, dtype=jnp.float32)   # only if n_static==E

    def _proj_b(p):
        return p["proj"]["b"] if "proj" in p else jnp.zeros((E,), jnp.float32)

    pk.add("s/w1", jnp.concatenate([p["mlp1"]["w"] for p in s_br], axis=1))
    pk.add("s/b1", jnp.concatenate([p["mlp1"]["b"] for p in s_br], axis=0))
    pk.add("s/w2", _block_diag([p["mlp2"]["w"] for p in s_br]))
    pk.add("s/b2", jnp.concatenate([p["mlp2"]["b"] for p in s_br], axis=0))
    pk.add("s/wp", jnp.concatenate([_proj_w(p) for p in s_br], axis=1))
    pk.add("s/bp", jnp.concatenate([_proj_b(p) for p in s_br], axis=0))
    pk.add("s/sc", jnp.concatenate([p["bn_scale"] for p in s_br], axis=0))
    pk.add("s/sh", jnp.concatenate([p["bn_shift"] for p in s_br], axis=0))

    # --- MLP_Feat over cat([a, b]) with a: n_a feats, b: E feats (mlp_x, mlp_z) --
    def add_pair(prefix, p, n_a):
        assert "proj" in p, prefix          # n_feat = n_a + E != E always
        w1 = p["mlp1"]["w"]
        pk.add(f"{prefix}/w1_a", w1[:n_a, :])
        pk.add(f"{prefix}/w1_b", w1[n_a:, :])
        pk.add(f"{prefix}/b1", p["mlp1"]["b"])
        pk.add(f"{prefix}/w2", p["mlp2"]["w"])
        pk.add(f"{prefix}/b2", p["mlp2"]["b"])
        wp = p["proj"]["w"]
        pk.add(f"{prefix}/wp_a", wp[:n_a, :])
        pk.add(f"{prefix}/wp_b", wp[n_a:, :])
        pk.add(f"{prefix}/bp", p["proj"]["b"])
        pk.add(f"{prefix}/sc", p["bn_scale"])
        pk.add(f"{prefix}/sh", p["bn_shift"])

    add_pair("mx", params["mlp_x"], n_ts)
    add_pair("mz", params["mlp_z"], n_dynamic_feat)

    # Constant selector matrices implementing cat([x', z'], -1) as two matmuls
    # (keeps activations lane-dense, no minor-dim concatenate in the kernel).
    pk.add("cat/px", jnp.concatenate(
        [jnp.eye(E, dtype=jnp.float32), jnp.zeros((E, E), jnp.float32)], axis=1))
    pk.add("cat/pz", jnp.concatenate(
        [jnp.zeros((E, E), jnp.float32), jnp.eye(E, dtype=jnp.float32)], axis=1))

    for i, blk in enumerate(params["mixer_blocks"]):
        tb = blk["mlp_time"]
        pk.add(f"b{i}/time_w", tb["lin"]["w"].T)        # (T, T) in (out, in) form
        add_tvec(f"b{i}/time_b", tb["lin"]["b"])
        add_tvec(f"b{i}/time_sc", tb["bn_scale"])
        add_tvec(f"b{i}/time_sh", tb["bn_shift"])

        # Feature-mixing block (3E -> E -> 3E); split across the (yt: 2E, sb: E)
        # halves of the concatenated input/residual so no concat is needed.
        fp = blk["mlp_feat"]
        w1 = fp["mlp1"]["w"]
        pk.add(f"b{i}/f/w1_a", w1[:2 * E, :])
        pk.add(f"b{i}/f/w1_b", w1[2 * E:, :])
        pk.add(f"b{i}/f/b1", fp["mlp1"]["b"])
        w2 = fp["mlp2"]["w"]
        pk.add(f"b{i}/f/w2_a", w2[:, :2 * E])
        pk.add(f"b{i}/f/w2_b", w2[:, 2 * E:])
        b2 = fp["mlp2"]["b"]
        pk.add(f"b{i}/f/b2_a", b2[:2 * E])
        pk.add(f"b{i}/f/b2_b", b2[2 * E:])
        pk.add(f"b{i}/f/sc_a", fp["bn_scale"][:2 * E])
        pk.add(f"b{i}/f/sc_b", fp["bn_scale"][2 * E:])
        pk.add(f"b{i}/f/sh_a", fp["bn_shift"][:2 * E])
        pk.add(f"b{i}/f/sh_b", fp["bn_shift"][2 * E:])

        wp = blk["proj"]["w"]
        pk.add(f"b{i}/p/w_a", wp[:2 * E, :])
        pk.add(f"b{i}/p/w_b", wp[2 * E:, :])
        pk.add(f"b{i}/p/b", blk["proj"]["b"])

    pk.add("out/w", params["mlp_out"]["w"])
    pk.add("out/b", params["mlp_out"]["b"])
    pk.add("ln/g", params["layer_norm"]["gamma"])
    pk.add("ln/b", params["layer_norm"]["beta"])

    slab, meta = pk.finalize()
    dims = dict(n_ts=n_ts, n_static_feat=n_static_feat, n_dynamic_feat=n_dynamic_feat,
                ts_length=ts_length, embed_dim=embed_dim, num_blocks=num_blocks,
                fcst_h=fcst_h, out_dim=out_dim, width=width)
    return slab, meta, dims


# -----------------------------------------------------------------------------
# Fused Pallas kernel: entire forward for one batch tile
# -----------------------------------------------------------------------------

def _fused_kernel(x_ref, z_ref, s_ref, p_ref, bdfc_ref, bdt_ref, o_ref, *,
                  meta, dims, bb, compute_dtype):
    E = dims["embed_dim"]
    n_ts = dims["n_ts"]
    num_blocks = dims["num_blocks"]
    C = 2 * E
    cdt = compute_dtype

    def w_(name):                       # full matrix slice from the slab
        off, r, c = meta[name]
        return p_ref[off:off + r, 0:c]

    def v_(name):                       # (1, c) feature vector (bias/BN/LN)
        off, _, c = meta[name]
        return p_ref[off:off + 1, 0:c]

    def t_(name, c):                    # (T, c) lane-replicated time vector
        off, r, _ = meta[name]
        return p_ref[off:off + r, 0:c]

    def tile_t(name, c):                # tiled to (bb*T, c); rows are (batch,time)
        v = t_(name, c)
        return v if bb == 1 else jnp.concatenate([v] * bb, axis=0)

    def mm(a, b):
        return jnp.dot(a.astype(cdt), b.astype(cdt),
                       preferred_element_type=jnp.float32)

    # ------------------------------ prologue ------------------------------
    s2 = s_ref[...]                      # (M, n_static)   loaded once, reused
    z2 = z_ref[...]                      # (M, n_dynamic)

    # fc_map over all bb batch elements at once via the block-diagonal weight.
    x_map = mm(bdfc_ref[...], x_ref[...]) + tile_t("fc/b", n_ts)     # (M, n_ts)

    # All static-feature MLP branches fused into one wide MLP over s2.
    sv = jnp.maximum(mm(s2, w_("s/w1")) + v_("s/b1"), 0.0)           # (M, G*E)
    su = mm(sv, w_("s/w2")) + v_("s/b2")
    sp = mm(s2, w_("s/wp")) + v_("s/bp")
    sfeat = (sp + su) * v_("s/sc") + v_("s/sh")                      # (M, G*E)
    sx = sfeat[:, 0:E]
    sz = sfeat[:, E:2 * E]

    def mlp_feat_pair(prefix, a, b):
        # MLP_Feat (eval) on cat([a, b], -1), concat replaced by split matmuls.
        v = jnp.maximum(mm(a, w_(f"{prefix}/w1_a")) + mm(b, w_(f"{prefix}/w1_b"))
                        + v_(f"{prefix}/b1"), 0.0)
        u = mm(v, w_(f"{prefix}/w2")) + v_(f"{prefix}/b2")
        h = mm(a, w_(f"{prefix}/wp_a")) + mm(b, w_(f"{prefix}/wp_b")) \
            + v_(f"{prefix}/bp")
        return (h + u) * v_(f"{prefix}/sc") + v_(f"{prefix}/sh")

    xp = mlp_feat_pair("mx", x_map, sx)                              # (M, E)
    zp = mlp_feat_pair("mz", z2, sz)                                 # (M, E)

    # y' = cat([x', z'], -1) via two constant selector matmuls (lane-dense).
    y = mm(xp, w_("cat/px")) + mm(zp, w_("cat/pz"))                  # (M, 2E)

    for i in range(num_blocks):
        # ---- time mixing: ONE block-diagonal (M,M)x(M,2E) matmul per block ----
        u = jnp.maximum(mm(bdt_ref[i], y) + tile_t(f"b{i}/time_b", C), 0.0)
        yt = (y + u) * tile_t(f"b{i}/time_sc", C) + tile_t(f"b{i}/time_sh", C)

        sb = sfeat[:, (2 + i) * E:(3 + i) * E]                       # (M, E)

        # ---- feature mixing (3E -> E -> 3E) + residual + BN, concat-free ----
        pf = f"b{i}/f"
        vmid = jnp.maximum(mm(yt, w_(f"{pf}/w1_a")) + mm(sb, w_(f"{pf}/w1_b"))
                           + v_(f"{pf}/b1"), 0.0)                    # (M, E)
        g_a = (yt + mm(vmid, w_(f"{pf}/w2_a")) + v_(f"{pf}/b2_a")) \
            * v_(f"{pf}/sc_a") + v_(f"{pf}/sh_a")                    # (M, 2E)
        g_b = (sb + mm(vmid, w_(f"{pf}/w2_b")) + v_(f"{pf}/b2_b")) \
            * v_(f"{pf}/sc_b") + v_(f"{pf}/sh_b")                    # (M, E)

        # ---- projector (3E -> 2E), split across the two concat halves ----
        y = mm(g_a, w_(f"b{i}/p/w_a")) + mm(g_b, w_(f"b{i}/p/w_b")) \
            + v_(f"b{i}/p/b")                                        # (M, 2E)

    # ------------- output head: Linear(2E -> out_dim) + LayerNorm -------------
    o = mm(y, w_("out/w")) + v_("out/b")                             # (M, out_dim)
    mu = jnp.mean(o, axis=-1, keepdims=True)
    var = jnp.mean(jnp.square(o - mu), axis=-1, keepdims=True)
    o = (o - mu) * jax.lax.rsqrt(var + 1e-5)
    o = o * v_("ln/g") + v_("ln/b")
    o_ref[...] = o.astype(o_ref.dtype)


# -----------------------------------------------------------------------------
# Wrapper
# -----------------------------------------------------------------------------

def _pick_batch_block(B, T, L, target_rows=256):
    """Batch tile: M = bb*T >= target_rows to amortize per-step overhead, but keep
    >= 2 grid steps when B allows (v7x megacore), and keep bb*T / bb*L multiples
    of 8 so every sublane slice/block lands on (8,128) tile boundaries."""
    bb = max(1, -(-target_rows // T))
    bb = min(bb, max(B, 1))
    if B >= 2:
        bb = min(bb, -(-B // 2))
    st = 8 // math.gcd(T, 8)
    sl = 8 // math.gcd(L, 8)
    step = st * sl // math.gcd(st, sl)
    return _round_up(bb, step)


def ts_mixer_forward(slab, x, z, s, *, meta, dims, batch_block=None,
                     compute_dtype=jnp.float32, vmem_limit_bytes=None):
    """Fused forward. Activation rows are (batch, time) ordered; the grid runs
    over batch tiles of bb elements (M = bb*fcst_h rows each)."""
    T = dims["fcst_h"]
    L = dims["ts_length"]
    n_ts = dims["n_ts"]
    n_dyn = dims["n_dynamic_feat"]
    n_st = dims["n_static_feat"]
    out_dim = dims["out_dim"]
    nb = dims["num_blocks"]

    B = x.shape[0]
    assert x.shape == (B, L, n_ts), x.shape
    assert z.shape == (B, T, n_dyn), z.shape
    assert s.shape == (B, T, n_st), s.shape

    bb = batch_block if batch_block is not None else _pick_batch_block(B, T, L)
    n_blk = -(-B // bb)
    B_pad = n_blk * bb
    if B_pad != B:                      # zero-pad batch; padded rows are sliced off
        pad = B_pad - B
        x = jnp.concatenate([x, jnp.zeros((pad, L, n_ts), x.dtype)], axis=0)
        z = jnp.concatenate([z, jnp.zeros((pad, T, n_dyn), z.dtype)], axis=0)
        s = jnp.concatenate([s, jnp.zeros((pad, T, n_st), s.dtype)], axis=0)

    M = bb * T
    Mx = bb * L
    x2 = x.reshape(B_pad * L, n_ts)
    z2 = z.reshape(B_pad * T, n_dyn)
    s2 = s.reshape(B_pad * T, n_st)

    # Block-diagonal fc/time weights for the chosen batch tile (tiny, built once
    # per call from the slab, resident in VMEM alongside it).
    def _slab_mat(name):
        off, r, c = meta[name]
        return slab[off:off + r, :c]

    eye_bb = jnp.eye(bb, dtype=slab.dtype)
    bd_fc = jnp.kron(eye_bb, _slab_mat("fc/wt"))                     # (M, Mx)
    if nb > 0:
        bd_time = jnp.stack([jnp.kron(eye_bb, _slab_mat(f"b{i}/time_w"))
                             for i in range(nb)])                    # (nb, M, M)
    else:
        bd_time = jnp.zeros((1, M, M), slab.dtype)

    kernel = functools.partial(_fused_kernel, meta=meta, dims=dims, bb=bb,
                               compute_dtype=compute_dtype)
    cp_kwargs = dict(dimension_semantics=("parallel",))
    if vmem_limit_bytes is not None:
        cp_kwargs["vmem_limit_bytes"] = vmem_limit_bytes

    out2 = pl.pallas_call(
        kernel,
        out_shape=jax.ShapeDtypeStruct((B_pad * T, out_dim), jnp.float32),
        grid=(n_blk,),
        in_specs=[
            pl.BlockSpec((Mx, n_ts), lambda i: (i, 0)),
            pl.BlockSpec((M, n_dyn), lambda i: (i, 0)),
            pl.BlockSpec((M, n_st), lambda i: (i, 0)),
            # Weights: whole-array resident in VMEM, copied once, no double-buffer.
            pl.BlockSpec(memory_space=pltpu.MemorySpace.VMEM),   # parameter slab
            pl.BlockSpec(memory_space=pltpu.MemorySpace.VMEM),   # block-diag fc
            pl.BlockSpec(memory_space=pltpu.MemorySpace.VMEM),   # block-diag time
        ],
        out_specs=pl.BlockSpec((M, out_dim), lambda i: (i, 0)),
        compiler_params=pltpu.CompilerParams(**cp_kwargs),
    )(x2, z2, s2, slab, bd_fc, bd_time)
    return out2[:B * T].reshape(B, T, out_dim)


# -----------------------------------------------------------------------------
# Deterministic parameter init (PyTorch-style; weights stored as (in, out))
# -----------------------------------------------------------------------------

def init_linear(key, in_f, out_f):
    k1, k2 = jax.random.split(key)
    bound = 1.0 / math.sqrt(in_f)
    return {"w": jax.random.uniform(k1, (in_f, out_f), jnp.float32, -bound, bound),
            "b": jax.random.uniform(k2, (out_f,), jnp.float32, -bound, bound)}


def init_bn(key, n, eps=1e-5):
    k1, k2, k3, k4 = jax.random.split(key, 4)
    gamma = 1.0 + 0.1 * jax.random.normal(k1, (n,), jnp.float32)
    beta = 0.1 * jax.random.normal(k2, (n,), jnp.float32)
    rmean = 0.1 * jax.random.normal(k3, (n,), jnp.float32)
    rvar = 1.0 + 0.1 * jnp.abs(jax.random.normal(k4, (n,), jnp.float32))
    scale = gamma / jnp.sqrt(rvar + eps)          # fold eval-mode BN into affine
    shift = beta - rmean * scale
    return scale, shift


def init_mlp_feat(key, n_feat, embed_dim):
    ks = jax.random.split(key, 4)
    p = {"mlp1": init_linear(ks[0], n_feat, embed_dim),
         "mlp2": init_linear(ks[1], embed_dim, embed_dim)}
    if n_feat != embed_dim:
        p["proj"] = init_linear(ks[2], n_feat, embed_dim)
    p["bn_scale"], p["bn_shift"] = init_bn(ks[3], embed_dim)
    return p


def init_mlp_feat_block(key, n_feat, embed_dim):
    ks = jax.random.split(key, 3)
    p = {"mlp1": init_linear(ks[0], n_feat, embed_dim),
         "mlp2": init_linear(ks[1], embed_dim, n_feat)}
    p["bn_scale"], p["bn_shift"] = init_bn(ks[2], n_feat)
    return p


def init_time_block(key, fcst_h):
    ks = jax.random.split(key, 2)
    p = {"lin": init_linear(ks[0], fcst_h, fcst_h)}
    p["bn_scale"], p["bn_shift"] = init_bn(ks[1], fcst_h)
    return p


def init_mixer_block(key, n_feat, n_static, fcst_h, embed_dim):
    ks = jax.random.split(key, 4)
    return {"mlp_time": init_time_block(ks[0], fcst_h),
            "mlp_s": init_mlp_feat(ks[1], n_static, embed_dim),
            "mlp_feat": init_mlp_feat_block(ks[2], n_feat, embed_dim),
            "proj": init_linear(ks[3], n_feat, 2 * embed_dim)}


def init_ts_mixer(key, n_ts, n_static_feat, n_dynamic_feat, ts_length,
                  embed_dim, num_blocks, fcst_h, out_dim):
    ks = jax.random.split(key, 6 + num_blocks)
    return {
        "fc_map": init_linear(ks[0], ts_length, fcst_h),
        "mlp_sx": init_mlp_feat(ks[1], n_static_feat, embed_dim),
        "mlp_sz": init_mlp_feat(ks[2], n_static_feat, embed_dim),
        "mlp_x": init_mlp_feat(ks[3], embed_dim + n_ts, embed_dim),
        "mlp_z": init_mlp_feat(ks[4], embed_dim + n_dynamic_feat, embed_dim),
        "mlp_out": init_linear(ks[5], 2 * embed_dim, out_dim),
        "layer_norm": {"gamma": jnp.ones((out_dim,), jnp.float32),
                       "beta": jnp.zeros((out_dim,), jnp.float32)},
        "mixer_blocks": [init_mixer_block(ks[6 + i], 3 * embed_dim,
                                          n_static_feat, fcst_h, embed_dim)
                         for i in range(num_blocks)],
    }


# -----------------------------------------------------------------------------
# Pure-JAX reference (same eval-mode semantics) for correctness checking
# -----------------------------------------------------------------------------

def _mlp_feat_ref(p, x):
    v = jax.nn.relu(x @ p["mlp1"]["w"] + p["mlp1"]["b"])
    u = v @ p["mlp2"]["w"] + p["mlp2"]["b"]
    h = (x @ p["proj"]["w"] + p["proj"]["b"]) if "proj" in p else x
    return (h + u) * p["bn_scale"] + p["bn_shift"]


def _time_block_ref(p, y):                                  # y: (B, T, C)
    w = p["lin"]["w"]                                       # (T, T), (in, out)
    u = jnp.einsum("btc,ts->bsc", y, w) + p["lin"]["b"][None, :, None]
    u = jax.nn.relu(u)
    yb = y + u
    return yb * p["bn_scale"][None, :, None] + p["bn_shift"][None, :, None]


def _feat_block_ref(p, x):
    v = jax.nn.relu(x @ p["mlp1"]["w"] + p["mlp1"]["b"])
    u = v @ p["mlp2"]["w"] + p["mlp2"]["b"]
    return (x + u) * p["bn_scale"] + p["bn_shift"]


def ts_mixer_forward_ref(params, x, z, s):
    xm = jnp.einsum("blc,lt->btc", x, params["fc_map"]["w"]) \
        + params["fc_map"]["b"][None, :, None]
    sx = _mlp_feat_ref(params["mlp_sx"], s)
    sz = _mlp_feat_ref(params["mlp_sz"], s)
    xp = _mlp_feat_ref(params["mlp_x"], jnp.concatenate([xm, sx], axis=-1))
    zp = _mlp_feat_ref(params["mlp_z"], jnp.concatenate([z, sz], axis=-1))
    y = jnp.concatenate([xp, zp], axis=-1)
    for blk in params["mixer_blocks"]:
        yt = _time_block_ref(blk["mlp_time"], y)
        sb = _mlp_feat_ref(blk["mlp_s"], s)
        fb = _feat_block_ref(blk["mlp_feat"], jnp.concatenate([yt, sb], axis=-1))
        y = fb @ blk["proj"]["w"] + blk["proj"]["b"]
    o = y @ params["mlp_out"]["w"] + params["mlp_out"]["b"]
    mu = o.mean(-1, keepdims=True)
    var = jnp.square(o - mu).mean(-1, keepdims=True)
    o = (o - mu) / jnp.sqrt(var + 1e-5)
    return o * params["layer_norm"]["gamma"] + params["layer_norm"]["beta"]


# -----------------------------------------------------------------------------
if __name__ == "__main__":
    key = jax.random.PRNGKey(0)
    kp, kx, kz, ks = jax.random.split(key, 4)

    B = 2
    n_ts, n_static, n_dyn = 3, 4, 5
    ts_length, embed_dim, num_blocks, fcst_h, out_dim = 16, 32, 2, 8, 6

    params = init_ts_mixer(kp, n_ts, n_static, n_dyn, ts_length,
                           embed_dim, num_blocks, fcst_h, out_dim)
    slab, meta, dims = pack_params(
        params, n_ts=n_ts, n_static_feat=n_static, n_dynamic_feat=n_dyn,
        ts_length=ts_length, embed_dim=embed_dim, num_blocks=num_blocks,
        fcst_h=fcst_h, out_dim=out_dim)

    x = jax.random.normal(kx, (B, ts_length, n_ts), jnp.float32)
    z = jax.random.normal(kz, (B, fcst_h, n_dyn), jnp.float32)
    s = jax.random.normal(ks, (B, fcst_h, n_static), jnp.float32)

    fwd = jax.jit(functools.partial(ts_mixer_forward, meta=meta, dims=dims))
    out = jax.block_until_ready(fwd(slab, x, z, s))

    assert out.shape == (B, fcst_h, out_dim), out.shape
    assert bool(jnp.all(jnp.isfinite(out)))

    # Cross-check against a pure-JAX reference with identical eval-mode semantics.
    # Tolerance: outputs are LayerNormed (unit scale), so packing/offset bugs show
    # up as O(0.1..1) errors; the bound below only has to absorb MXU pass-precision
    # rounding of f32 matmuls (not guaranteed bit-exact across TPU generations).
    with jax.default_matmul_precision("highest"):
        ref = jax.block_until_ready(ts_mixer_forward_ref(params, x, z, s))
    max_err = float(jnp.max(jnp.abs(out - ref)))
    mean_err = float(jnp.mean(jnp.abs(out - ref)))
    assert max_err < 3e-2, max_err
    assert mean_err < 3e-3, mean_err

    print("KERNEL_OK")
</pallas_src>

<mosaic_0001>
module attributes {stable_mosaic.version = 11 : i64} {
  func.func @_fused_kernel(%arg0: i32, %arg1: memref<16x3xf32, #tpu.memory_space<vmem>>, %arg2: memref<8x5xf32, #tpu.memory_space<vmem>>, %arg3: memref<8x4xf32, #tpu.memory_space<vmem>>, %arg4: memref<1360x128xf32, #tpu.memory_space<vmem>>, %arg5: memref<8x16xf32, #tpu.memory_space<vmem>>, %arg6: memref<2x8x8xf32, #tpu.memory_space<vmem>>, %arg7: memref<8x6xf32, #tpu.memory_space<vmem>>) attributes {dimension_semantics = [#tpu.dimension_semantics<parallel>], iteration_bounds = array<i64: 2>, scalar_prefetch = 0 : i64, scratch_operands = 0 : i64, tpu.core_type = #tpu.core_type<tc>, window_params = [{transform_indices = @transform_0, window_bounds = array<i64: 16, 3>}, {transform_indices = @transform_1, window_bounds = array<i64: 8, 5>}, {transform_indices = @transform_2, window_bounds = array<i64: 8, 4>}, {pipeline_mode = #tpu.pipeline_mode<synchronous>, transform_indices = @transform_3, window_bounds = array<i64: 1360, 128>}, {pipeline_mode = #tpu.pipeline_mode<synchronous>, transform_indices = @transform_4, window_bounds = array<i64: 8, 16>}, {pipeline_mode = #tpu.pipeline_mode<synchronous>, transform_indices = @transform_5, window_bounds = array<i64: 2, 8, 8>}, {transform_indices = @transform_6, window_bounds = array<i64: 8, 6>}]} {
    %c0 = arith.constant 0 : index
    %c0_0 = arith.constant 0 : index
    %0 = vector.load %arg3[%c0, %c0_0] : memref<8x4xf32, #tpu.memory_space<vmem>>, vector<8x4xf32>
    %c0_1 = arith.constant 0 : index
    %c0_2 = arith.constant 0 : index
    %1 = vector.load %arg2[%c0_1, %c0_2] : memref<8x5xf32, #tpu.memory_space<vmem>>, vector<8x5xf32>
    %c0_3 = arith.constant 0 : index
    %c0_4 = arith.constant 0 : index
    %2 = vector.load %arg5[%c0_3, %c0_4] : memref<8x16xf32, #tpu.memory_space<vmem>>, vector<8x16xf32>
    %c0_5 = arith.constant 0 : index
    %c0_6 = arith.constant 0 : index
    %3 = vector.load %arg1[%c0_5, %c0_6] : memref<16x3xf32, #tpu.memory_space<vmem>>, vector<16x3xf32>
    %cst = arith.constant dense<0.000000e+00> : vector<8x3xf32>
    %4 = tpu.matmul %2, %3, %cst {dimension_numbers = #tpu.dot_dimension_numbers<[1], [0], [0], [1], [0, 0, 1, 1], [], []>} : vector<8x16xf32>, vector<16x3xf32>, vector<8x3xf32> -> vector<8x3xf32>
    %c8 = arith.constant 8 : index
    %c0_7 = arith.constant 0 : index
    %5 = vector.load %arg4[%c8, %c0_7] : memref<1360x128xf32, #tpu.memory_space<vmem>>, vector<8x3xf32>
    %6 = arith.addf %4, %5 : vector<8x3xf32>
    %c16 = arith.constant 16 : index
    %c0_8 = arith.constant 0 : index
    %7 = vector.load %arg4[%c16, %c0_8] : memref<1360x128xf32, #tpu.memory_space<vmem>>, vector<4x128xf32>
    %cst_9 = arith.constant dense<0.000000e+00> : vector<8x128xf32>
    %8 = tpu.matmul %0, %7, %cst_9 {dimension_numbers = #tpu.dot_dimension_numbers<[1], [0], [0], [1], [0, 0, 1, 1], [], []>} : vector<8x4xf32>, vector<4x128xf32>, vector<8x128xf32> -> vector<8x128xf32>
    %c24 = arith.constant 24 : index
    %c0_10 = arith.constant 0 : index
    %9 = vector.load %arg4[%c24, %c0_10] : memref<1360x128xf32, #tpu.memory_space<vmem>>, vector<1x128xf32>
    %10 = vector.broadcast %9 : vector<1x128xf32> to vector<8x128xf32>
    %11 = arith.addf %8, %10 : vector<8x128xf32>
    %cst_11 = arith.constant 0.000000e+00 : f32
    %12 = vector.broadcast %cst_11 : f32 to vector<8x128xf32>
    %13 = arith.maximumf %11, %12 : vector<8x128xf32>
    %c32 = arith.constant 32 : index
    %c0_12 = arith.constant 0 : index
    %14 = vector.load %arg4[%c32, %c0_12] : memref<1360x128xf32, #tpu.memory_space<vmem>>, vector<128x128xf32>
    %cst_13 = arith.constant dense<0.000000e+00> : vector<8x128xf32>
    %15 = tpu.matmul %13, %14, %cst_13 {dimension_numbers = #tpu.dot_dimension_numbers<[1], [0], [0], [1], [0, 0, 1, 1], [], []>} : vector<8x128xf32>, vector<128x128xf32>, vector<8x128xf32> -> vector<8x128xf32>
    %c160 = arith.constant 160 : index
    %c0_14 = arith.constant 0 : index
    %16 = vector.load %arg4[%c160, %c0_14] : memref<1360x128xf32, #tpu.memory_space<vmem>>, vector<1x128xf32>
    %17 = vector.broadcast %16 : vector<1x128xf32> to vector<8x128xf32>
    %18 = arith.addf %15, %17 : vector<8x128xf32>
    %c168 = arith.constant 168 : index
    %c0_15 = arith.constant 0 : index
    %19 = vector.load %arg4[%c168, %c0_15] : memref<1360x128xf32, #tpu.memory_space<vmem>>, vector<4x128xf32>
    %cst_16 = arith.constant dense<0.000000e+00> : vector<8x128xf32>
    %20 = tpu.matmul %0, %19, %cst_16 {dimension_numbers = #tpu.dot_dimension_numbers<[1], [0], [0], [1], [0, 0, 1, 1], [], []>} : vector<8x4xf32>, vector<4x128xf32>, vector<8x128xf32> -> vector<8x128xf32>
    %c176 = arith.constant 176 : index
    %c0_17 = arith.constant 0 : index
    %21 = vector.load %arg4[%c176, %c0_17] : memref<1360x128xf32, #tpu.memory_space<vmem>>, vector<1x128xf32>
    %22 = vector.broadcast %21 : vector<1x128xf32> to vector<8x128xf32>
    %23 = arith.addf %20, %22 : vector<8x128xf32>
    %24 = arith.addf %23, %18 : vector<8x128xf32>
    %c184 = arith.constant 184 : index
    %c0_18 = arith.constant 0 : index
    %25 = vector.load %arg4[%c184, %c0_18] : memref<1360x128xf32, #tpu.memory_space<vmem>>, vector<1x128xf32>
    %26 = vector.broadcast %25 : vector<1x128xf32> to vector<8x128xf32>
    %27 = arith.mulf %24, %26 : vector<8x128xf32>
    %c192 = arith.constant 192 : index
    %c0_19 = arith.constant 0 : index
    %28 = vector.load %arg4[%c192, %c0_19] : memref<1360x128xf32, #tpu.memory_space<vmem>>, vector<1x128xf32>
    %29 = vector.broadcast %28 : vector<1x128xf32> to vector<8x128xf32>
    %30 = arith.addf %27, %29 : vector<8x128xf32>
    %31 = vector.extract_strided_slice %30 {offsets = [0, 0], sizes = [8, 32], strides = [1, 1]} : vector<8x128xf32> to vector<8x32xf32>
    %32 = vector.extract_strided_slice %30 {offsets = [0, 32], sizes = [8, 32], strides = [1, 1]} : vector<8x128xf32> to vector<8x32xf32>
    %c200 = arith.constant 200 : index
    %c0_20 = arith.constant 0 : index
    %33 = vector.load %arg4[%c200, %c0_20] : memref<1360x128xf32, #tpu.memory_space<vmem>>, vector<3x32xf32>
    %cst_21 = arith.constant dense<0.000000e+00> : vector<8x32xf32>
    %34 = tpu.matmul %6, %33, %cst_21 {dimension_numbers = #tpu.dot_dimension_numbers<[1], [0], [0], [1], [0, 0, 1, 1], [], []>} : vector<8x3xf32>, vector<3x32xf32>, vector<8x32xf32> -> vector<8x32xf32>
    %c208 = arith.constant 208 : index
    %c0_22 = arith.constant 0 : index
    %35 = vector.load %arg4[%c208, %c0_22] : memref<1360x128xf32, #tpu.memory_space<vmem>>, vector<32x32xf32>
    %cst_23 = arith.constant dense<0.000000e+00> : vector<8x32xf32>
    %36 = tpu.matmul %31, %35, %cst_23 {dimension_numbers = #tpu.dot_dimension_numbers<[1], [0], [0], [1], [0, 0, 1, 1], [], []>} : vector<8x32xf32>, vector<32x32xf32>, vector<8x32xf32> -> vector<8x32xf32>
    %37 = arith.addf %34, %36 : vector<8x32xf32>
    %c240 = arith.constant 240 : index
    %c0_24 = arith.constant 0 : index
    %38 = vector.load %arg4[%c240, %c0_24] : memref<1360x128xf32, #tpu.memory_space<vmem>>, vector<1x32xf32>
    %39 = vector.broadcast %38 : vector<1x32xf32> to vector<8x32xf32>
    %40 = arith.addf %37, %39 : vector<8x32xf32>
    %cst_25 = arith.constant 0.000000e+00 : f32
    %41 = vector.broadcast %cst_25 : f32 to vector<8x32xf32>
    %42 = arith.maximumf %40, %41 : vector<8x32xf32>
    %c248 = arith.constant 248 : index
    %c0_26 = arith.constant 0 : index
    %43 = vector.load %arg4[%c248, %c0_26] : memref<1360x128xf32, #tpu.memory_space<vmem>>, vector<32x32xf32>
    %cst_27 = arith.constant dense<0.000000e+00> : vector<8x32xf32>
    %44 = tpu.matmul %42, %43, %cst_27 {dimension_numbers = #tpu.dot_dimension_numbers<[1], [0], [0], [1], [0, 0, 1, 1], [], []>} : vector<8x32xf32>, vector<32x32xf32>, vector<8x32xf32> -> vector<8x32xf32>
    %c280 = arith.constant 280 : index
    %c0_28 = arith.constant 0 : index
    %45 = vector.load %arg4[%c280, %c0_28] : memref<1360x128xf32, #tpu.memory_space<vmem>>, vector<1x32xf32>
    %46 = vector.broadcast %45 : vector<1x32xf32> to vector<8x32xf32>
    %47 = arith.addf %44, %46 : vector<8x32xf32>
    %c288 = arith.constant 288 : index
    %c0_29 = arith.constant 0 : index
    %48 = vector.load %arg4[%c288, %c0_29] : memref<1360x128xf32, #tpu.memory_space<vmem>>, vector<3x32xf32>
    %cst_30 = arith.constant dense<0.000000e+00> : vector<8x32xf32>
    %49 = tpu.matmul %6, %48, %cst_30 {dimension_numbers = #tpu.dot_dimension_numbers<[1], [0], [0], [1], [0, 0, 1, 1], [], []>} : vector<8x3xf32>, vector<3x32xf32>, vector<8x32xf32> -> vector<8x32xf32>
    %c296 = arith.constant 296 : index
    %c0_31 = arith.constant 0 : index
    %50 = vector.load %arg4[%c296, %c0_31] : memref<1360x128xf32, #tpu.memory_space<vmem>>, vector<32x32xf32>
    %cst_32 = arith.constant dense<0.000000e+00> : vector<8x32xf32>
    %51 = tpu.matmul %31, %50, %cst_32 {dimension_numbers = #tpu.dot_dimension_numbers<[1], [0], [0], [1], [0, 0, 1, 1], [], []>} : vector<8x32xf32>, vector<32x32xf32>, vector<8x32xf32> -> vector<8x32xf32>
    %52 = arith.addf %49, %51 : vector<8x32xf32>
    %c328 = arith.constant 328 : index
    %c0_33 = arith.constant 0 : index
    %53 = vector.load %arg4[%c328, %c0_33] : memref<1360x128xf32, #tpu.memory_space<vmem>>, vector<1x32xf32>
    %54 = vector.broadcast %53 : vector<1x32xf32> to vector<8x32xf32>
    %55 = arith.addf %52, %54 : vector<8x32xf32>
    %56 = arith.addf %55, %47 : vector<8x32xf32>
    %c336 = arith.constant 336 : index
    %c0_34 = arith.constant 0 : index
    %57 = vector.load %arg4[%c336, %c0_34] : memref<1360x128xf32, #tpu.memory_space<vmem>>, vector<1x32xf32>
    %58 = vector.broadcast %57 : vector<1x32xf32> to vector<8x32xf32>
    %59 = arith.mulf %56, %58 : vector<8x32xf32>
    %c344 = arith.constant 344 : index
    %c0_35 = arith.constant 0 : index
    %60 = vector.load %arg4[%c344, %c0_35] : memref<1360x128xf32, #tpu.memory_space<vmem>>, vector<1x32xf32>
    %61 = vector.broadcast %60 : vector<1x32xf32> to vector<8x32xf32>
    %62 = arith.addf %59, %61 : vector<8x32xf32>
    %c352 = arith.constant 352 : index
    %c0_36 = arith.constant 0 : index
    %63 = vector.load %arg4[%c352, %c0_36] : memref<1360x128xf32, #tpu.memory_space<vmem>>, vector<5x32xf32>
    %cst_37 = arith.constant dense<0.000000e+00> : vector<8x32xf32>
    %64 = tpu.matmul %1, %63, %cst_37 {dimension_numbers = #tpu.dot_dimension_numbers<[1], [0], [0], [1], [0, 0, 1, 1], [], []>} : vector<8x5xf32>, vector<5x32xf32>, vector<8x32xf32> -> vector<8x32xf32>
    %c360 = arith.constant 360 : index
    %c0_38 = arith.constant 0 : index
    %65 = vector.load %arg4[%c360, %c0_38] : memref<1360x128xf32, #tpu.memory_space<vmem>>, vector<32x32xf32>
    %cst_39 = arith.constant dense<0.000000e+00> : vector<8x32xf32>
    %66 = tpu.matmul %32, %65, %cst_39 {dimension_numbers = #tpu.dot_dimension_numbers<[1], [0], [0], [1], [0, 0, 1, 1], [], []>} : vector<8x32xf32>, vector<32x32xf32>, vector<8x32xf32> -> vector<8x32xf32>
    %67 = arith.addf %64, %66 : vector<8x32xf32>
    %c392 = arith.constant 392 : index
    %c0_40 = arith.constant 0 : index
    %68 = vector.load %arg4[%c392, %c0_40] : memref<1360x128xf32, #tpu.memory_space<vmem>>, vector<1x32xf32>
    %69 = vector.broadcast %68 : vector<1x32xf32> to vector<8x32xf32>
    %70 = arith.addf %67, %69 : vector<8x32xf32>
    %cst_41 = arith.constant 0.000000e+00 : f32
    %71 = vector.broadcast %cst_41 : f32 to vector<8x32xf32>
    %72 = arith.maximumf %70, %71 : vector<8x32xf32>
    %c400 = arith.constant 400 : index
    %c0_42 = arith.constant 0 : index
    %73 = vector.load %arg4[%c400, %c0_42] : memref<1360x128xf32, #tpu.memory_space<vmem>>, vector<32x32xf32>
    %cst_43 = arith.constant dense<0.000000e+00> : vector<8x32xf32>
    %74 = tpu.matmul %72, %73, %cst_43 {dimension_numbers = #tpu.dot_dimension_numbers<[1], [0], [0], [1], [0, 0, 1, 1], [], []>} : vector<8x32xf32>, vector<32x32xf32>, vector<8x32xf32> -> vector<8x32xf32>
    %c432 = arith.constant 432 : index
    %c0_44 = arith.constant 0 : index
    %75 = vector.load %arg4[%c432, %c0_44] : memref<1360x128xf32, #tpu.memory_space<vmem>>, vector<1x32xf32>
    %76 = vector.broadcast %75 : vector<1x32xf32> to vector<8x32xf32>
    %77 = arith.addf %74, %76 : vector<8x32xf32>
    %c440 = arith.constant 440 : index
    %c0_45 = arith.constant 0 : index
    %78 = vector.load %arg4[%c440, %c0_45] : memref<1360x128xf32, #tpu.memory_space<vmem>>, vector<5x32xf32>
    %cst_46 = arith.constant dense<0.000000e+00> : vector<8x32xf32>
    %79 = tpu.matmul %1, %78, %cst_46 {dimension_numbers = #tpu.dot_dimension_numbers<[1], [0], [0], [1], [0, 0, 1, 1], [], []>} : vector<8x5xf32>, vector<5x32xf32>, vector<8x32xf32> -> vector<8x32xf32>
    %c448 = arith.constant 448 : index
    %c0_47 = arith.constant 0 : index
    %80 = vector.load %arg4[%c448, %c0_47] : memref<1360x128xf32, #tpu.memory_space<vmem>>, vector<32x32xf32>
    %cst_48 = arith.constant dense<0.000000e+00> : vector<8x32xf32>
    %81 = tpu.matmul %32, %80, %cst_48 {dimension_numbers = #tpu.dot_dimension_numbers<[1], [0], [0], [1], [0, 0, 1, 1], [], []>} : vector<8x32xf32>, vector<32x32xf32>, vector<8x32xf32> -> vector<8x32xf32>
    %82 = arith.addf %79, %81 : vector<8x32xf32>
    %c480 = arith.constant 480 : index
    %c0_49 = arith.constant 0 : index
    %83 = vector.load %arg4[%c480, %c0_49] : memref<1360x128xf32, #tpu.memory_space<vmem>>, vector<1x32xf32>
    %84 = vector.broadcast %83 : vector<1x32xf32> to vector<8x32xf32>
    %85 = arith.addf %82, %84 : vector<8x32xf32>
    %86 = arith.addf %85, %77 : vector<8x32xf32>
    %c488 = arith.constant 488 : index
    %c0_50 = arith.constant 0 : index
    %87 = vector.load %arg4[%c488, %c0_50] : memref<1360x128xf32, #tpu.memory_space<vmem>>, vector<1x32xf32>
    %88 = vector.broadcast %87 : vector<1x32xf32> to vector<8x32xf32>
    %89 = arith.mulf %86, %88 : vector<8x32xf32>
    %c496 = arith.constant 496 : index
    %c0_51 = arith.constant 0 : index
    %90 = vector.load %arg4[%c496, %c0_51] : memref<1360x128xf32, #tpu.memory_space<vmem>>, vector<1x32xf32>
    %91 = vector.broadcast %90 : vector<1x32xf32> to vector<8x32xf32>
    %92 = arith.addf %89, %91 : vector<8x32xf32>
    %c504 = arith.constant 504 : index
    %c0_52 = arith.constant 0 : index
    %93 = vector.load %arg4[%c504, %c0_52] : memref<1360x128xf32, #tpu.memory_space<vmem>>, vector<32x64xf32>
    %cst_53 = arith.constant dense<0.000000e+00> : vector<8x64xf32>
    %94 = tpu.matmul %62, %93, %cst_53 {dimension_numbers = #tpu.dot_dimension_numbers<[1], [0], [0], [1], [0, 0, 1, 1], [], []>} : vector<8x32xf32>, vector<32x64xf32>, vector<8x64xf32> -> vector<8x64xf32>
    %c536 = arith.constant 536 : index
    %c0_54 = arith.constant 0 : index
    %95 = vector.load %arg4[%c536, %c0_54] : memref<1360x128xf32, #tpu.memory_space<vmem>>, vector<32x64xf32>
    %cst_55 = arith.constant dense<0.000000e+00> : vector<8x64xf32>
    %96 = tpu.matmul %92, %95, %cst_55 {dimension_numbers = #tpu.dot_dimension_numbers<[1], [0], [0], [1], [0, 0, 1, 1], [], []>} : vector<8x32xf32>, vector<32x64xf32>, vector<8x64xf32> -> vector<8x64xf32>
    %97 = arith.addf %94, %96 : vector<8x64xf32>
    %c0_56 = arith.constant 0 : index
    %c0_57 = arith.constant 0 : index
    %c0_58 = arith.constant 0 : index
    %98 = vector.load %arg6[%c0_56, %c0_57, %c0_58] : memref<2x8x8xf32, #tpu.memory_space<vmem>>, vector<1x8x8xf32>
    %99 = vector.shape_cast %98 : vector<1x8x8xf32> to vector<8x8xf32>
    %cst_59 = arith.constant dense<0.000000e+00> : vector<8x64xf32>
    %100 = tpu.matmul %99, %97, %cst_59 {dimension_numbers = #tpu.dot_dimension_numbers<[1], [0], [0], [1], [0, 0, 1, 1], [], []>} : vector<8x8xf32>, vector<8x64xf32>, vector<8x64xf32> -> vector<8x64xf32>
    %c576 = arith.constant 576 : index
    %c0_60 = arith.constant 0 : index
    %101 = vector.load %arg4[%c576, %c0_60] : memref<1360x128xf32, #tpu.memory_space<vmem>>, vector<8x64xf32>
    %102 = arith.addf %100, %101 : vector<8x64xf32>
    %cst_61 = arith.constant 0.000000e+00 : f32
    %103 = vector.broadcast %cst_61 : f32 to vector<8x64xf32>
    %104 = arith.maximumf %102, %103 : vector<8x64xf32>
    %105 = arith.addf %97, %104 : vector<8x64xf32>
    %c584 = arith.constant 584 : index
    %c0_62 = arith.constant 0 : index
    %106 = vector.load %arg4[%c584, %c0_62] : memref<1360x128xf32, #tpu.memory_space<vmem>>, vector<8x64xf32>
    %107 = arith.mulf %105, %106 : vector<8x64xf32>
    %c592 = arith.constant 592 : index
    %c0_63 = arith.constant 0 : index
    %108 = vector.load %arg4[%c592, %c0_63] : memref<1360x128xf32, #tpu.memory_space<vmem>>, vector<8x64xf32>
    %109 = arith.addf %107, %108 : vector<8x64xf32>
    %110 = vector.extract_strided_slice %30 {offsets = [0, 64], sizes = [8, 32], strides = [1, 1]} : vector<8x128xf32> to vector<8x32xf32>
    %c600 = arith.constant 600 : index
    %c0_64 = arith.constant 0 : index
    %111 = vector.load %arg4[%c600, %c0_64] : memref<1360x128xf32, #tpu.memory_space<vmem>>, vector<64x32xf32>
    %cst_65 = arith.constant dense<0.000000e+00> : vector<8x32xf32>
    %112 = tpu.matmul %109, %111, %cst_65 {dimension_numbers = #tpu.dot_dimension_numbers<[1], [0], [0], [1], [0, 0, 1, 1], [], []>} : vector<8x64xf32>, vector<64x32xf32>, vector<8x32xf32> -> vector<8x32xf32>
    %c664 = arith.constant 664 : index
    %c0_66 = arith.constant 0 : index
    %113 = vector.load %arg4[%c664, %c0_66] : memref<1360x128xf32, #tpu.memory_space<vmem>>, vector<32x32xf32>
    %cst_67 = arith.constant dense<0.000000e+00> : vector<8x32xf32>
    %114 = tpu.matmul %110, %113, %cst_67 {dimension_numbers = #tpu.dot_dimension_numbers<[1], [0], [0], [1], [0, 0, 1, 1], [], []>} : vector<8x32xf32>, vector<32x32xf32>, vector<8x32xf32> -> vector<8x32xf32>
    %115 = arith.addf %112, %114 : vector<8x32xf32>
    %c696 = arith.constant 696 : index
    %c0_68 = arith.constant 0 : index
    %116 = vector.load %arg4[%c696, %c0_68] : memref<1360x128xf32, #tpu.memory_space<vmem>>, vector<1x32xf32>
    %117 = vector.broadcast %116 : vector<1x32xf32> to vector<8x32xf32>
    %118 = arith.addf %115, %117 : vector<8x32xf32>
    %cst_69 = arith.constant 0.000000e+00 : f32
    %119 = vector.broadcast %cst_69 : f32 to vector<8x32xf32>
    %120 = arith.maximumf %118, %119 : vector<8x32xf32>
    %c704 = arith.constant 704 : index
    %c0_70 = arith.constant 0 : index
    %121 = vector.load %arg4[%c704, %c0_70] : memref<1360x128xf32, #tpu.memory_space<vmem>>, vector<32x64xf32>
    %cst_71 = arith.constant dense<0.000000e+00> : vector<8x64xf32>
    %122 = tpu.matmul %120, %121, %cst_71 {dimension_numbers = #tpu.dot_dimension_numbers<[1], [0], [0], [1], [0, 0, 1, 1], [], []>} : vector<8x32xf32>, vector<32x64xf32>, vector<8x64xf32> -> vector<8x64xf32>
    %123 = arith.addf %109, %122 : vector<8x64xf32>
    %c768 = arith.constant 768 : index
    %c0_72 = arith.constant 0 : index
    %124 = vector.load %arg4[%c768, %c0_72] : memref<1360x128xf32, #tpu.memory_space<vmem>>, vector<1x64xf32>
    %125 = vector.broadcast %124 : vector<1x64xf32> to vector<8x64xf32>
    %126 = arith.addf %123, %125 : vector<8x64xf32>
    %c784 = arith.constant 784 : index
    %c0_73 = arith.constant 0 : index
    %127 = vector.load %arg4[%c784, %c0_73] : memref<1360x128xf32, #tpu.memory_space<vmem>>, vector<1x64xf32>
    %128 = vector.broadcast %127 : vector<1x64xf32> to vector<8x64xf32>
    %129 = arith.mulf %126, %128 : vector<8x64xf32>
    %c800 = arith.constant 800 : index
    %c0_74 = arith.constant 0 : index
    %130 = vector.load %arg4[%c800, %c0_74] : memref<1360x128xf32, #tpu.memory_space<vmem>>, vector<1x64xf32>
    %131 = vector.broadcast %130 : vector<1x64xf32> to vector<8x64xf32>
    %132 = arith.addf %129, %131 : vector<8x64xf32>
    %c736 = arith.constant 736 : index
    %c0_75 = arith.constant 0 : index
    %133 = vector.load %arg4[%c736, %c0_75] : memref<1360x128xf32, #tpu.memory_space<vmem>>, vector<32x32xf32>
    %cst_76 = arith.constant dense<0.000000e+00> : vector<8x32xf32>
    %134 = tpu.matmul %120, %133, %cst_76 {dimension_numbers = #tpu.dot_dimension_numbers<[1], [0], [0], [1], [0, 0, 1, 1], [], []>} : vector<8x32xf32>, vector<32x32xf32>, vector<8x32xf32> -> vector<8x32xf32>
    %135 = arith.addf %110, %134 : vector<8x32xf32>
    %c776 = arith.constant 776 : index
    %c0_77 = arith.constant 0 : index
    %136 = vector.load %arg4[%c776, %c0_77] : memref<1360x128xf32, #tpu.memory_space<vmem>>, vector<1x32xf32>
    %137 = vector.broadcast %136 : vector<1x32xf32> to vector<8x32xf32>
    %138 = arith.addf %135, %137 : vector<8x32xf32>
    %c792 = arith.constant 792 : index
    %c0_78 = arith.constant 0 : index
    %139 = vector.load %arg4[%c792, %c0_78] : memref<1360x128xf32, #tpu.memory_space<vmem>>, vector<1x32xf32>
    %140 = vector.broadcast %139 : vector<1x32xf32> to vector<8x32xf32>
    %141 = arith.mulf %138, %140 : vector<8x32xf32>
    %c808 = arith.constant 808 : index
    %c0_79 = arith.constant 0 : index
    %142 = vector.load %arg4[%c808, %c0_79] : memref<1360x128xf32, #tpu.memory_space<vmem>>, vector<1x32xf32>
    %143 = vector.broadcast %142 : vector<1x32xf32> to vector<8x32xf32>
    %144 = arith.addf %141, %143 : vector<8x32xf32>
    %c816 = arith.constant 816 : index
    %c0_80 = arith.constant 0 : index
    %145 = vector.load %arg4[%c816, %c0_80] : memref<1360x128xf32, #tpu.memory_space<vmem>>, vector<64x64xf32>
    %cst_81 = arith.constant dense<0.000000e+00> : vector<8x64xf32>
    %146 = tpu.matmul %132, %145, %cst_81 {dimension_numbers = #tpu.dot_dimension_numbers<[1], [0], [0], [1], [0, 0, 1, 1], [], []>} : vector<8x64xf32>, vector<64x64xf32>, vector<8x64xf32> -> vector<8x64xf32>
    %c880 = arith.constant 880 : index
    %c0_82 = arith.constant 0 : index
    %147 = vector.load %arg4[%c880, %c0_82] : memref<1360x128xf32, #tpu.memory_space<vmem>>, vector<32x64xf32>
    %cst_83 = arith.constant dense<0.000000e+00> : vector<8x64xf32>
    %148 = tpu.matmul %144, %147, %cst_83 {dimension_numbers = #tpu.dot_dimension_numbers<[1], [0], [0], [1], [0, 0, 1, 1], [], []>} : vector<8x32xf32>, vector<32x64xf32>, vector<8x64xf32> -> vector<8x64xf32>
    %149 = arith.addf %146, %148 : vector<8x64xf32>
    %c912 = arith.constant 912 : index
    %c0_84 = arith.constant 0 : index
    %150 = vector.load %arg4[%c912, %c0_84] : memref<1360x128xf32, #tpu.memory_space<vmem>>, vector<1x64xf32>
    %151 = vector.broadcast %150 : vector<1x64xf32> to vector<8x64xf32>
    %152 = arith.addf %149, %151 : vector<8x64xf32>
    %c1 = arith.constant 1 : index
    %c0_85 = arith.constant 0 : index
    %c0_86 = arith.constant 0 : index
    %153 = vector.load %arg6[%c1, %c0_85, %c0_86] : memref<2x8x8xf32, #tpu.memory_space<vmem>>, vector<1x8x8xf32>
    %154 = vector.shape_cast %153 : vector<1x8x8xf32> to vector<8x8xf32>
    %cst_87 = arith.constant dense<0.000000e+00> : vector<8x64xf32>
    %155 = tpu.matmul %154, %152, %cst_87 {dimension_numbers = #tpu.dot_dimension_numbers<[1], [0], [0], [1], [0, 0, 1, 1], [], []>} : vector<8x8xf32>, vector<8x64xf32>, vector<8x64xf32> -> vector<8x64xf32>
    %c928 = arith.constant 928 : index
    %c0_88 = arith.constant 0 : index
    %156 = vector.load %arg4[%c928, %c0_88] : memref<1360x128xf32, #tpu.memory_space<vmem>>, vector<8x64xf32>
    %157 = arith.addf %155, %156 : vector<8x64xf32>
    %cst_89 = arith.constant 0.000000e+00 : f32
    %158 = vector.broadcast %cst_89 : f32 to vector<8x64xf32>
    %159 = arith.maximumf %157, %158 : vector<8x64xf32>
    %160 = arith.addf %152, %159 : vector<8x64xf32>
    %c936 = arith.constant 936 : index
    %c0_90 = arith.constant 0 : index
    %161 = vector.load %arg4[%c936, %c0_90] : memref<1360x128xf32, #tpu.memory_space<vmem>>, vector<8x64xf32>
    %162 = arith.mulf %160, %161 : vector<8x64xf32>
    %c944 = arith.constant 944 : index
    %c0_91 = arith.constant 0 : index
    %163 = vector.load %arg4[%c944, %c0_91] : memref<1360x128xf32, #tpu.memory_space<vmem>>, vector<8x64xf32>
    %164 = arith.addf %162, %163 : vector<8x64xf32>
    %165 = vector.extract_strided_slice %30 {offsets = [0, 96], sizes = [8, 32], strides = [1, 1]} : vector<8x128xf32> to vector<8x32xf32>
    %c952 = arith.constant 952 : index
    %c0_92 = arith.constant 0 : index
    %166 = vector.load %arg4[%c952, %c0_92] : memref<1360x128xf32, #tpu.memory_space<vmem>>, vector<64x32xf32>
    %cst_93 = arith.constant dense<0.000000e+00> : vector<8x32xf32>
    %167 = tpu.matmul %164, %166, %cst_93 {dimension_numbers = #tpu.dot_dimension_numbers<[1], [0], [0], [1], [0, 0, 1, 1], [], []>} : vector<8x64xf32>, vector<64x32xf32>, vector<8x32xf32> -> vector<8x32xf32>
    %c1016 = arith.constant 1016 : index
    %c0_94 = arith.constant 0 : index
    %168 = vector.load %arg4[%c1016, %c0_94] : memref<1360x128xf32, #tpu.memory_space<vmem>>, vector<32x32xf32>
    %cst_95 = arith.constant dense<0.000000e+00> : vector<8x32xf32>
    %169 = tpu.matmul %165, %168, %cst_95 {dimension_numbers = #tpu.dot_dimension_numbers<[1], [0], [0], [1], [0, 0, 1, 1], [], []>} : vector<8x32xf32>, vector<32x32xf32>, vector<8x32xf32> -> vector<8x32xf32>
    %170 = arith.addf %167, %169 : vector<8x32xf32>
    %c1048 = arith.constant 1048 : index
    %c0_96 = arith.constant 0 : index
    %171 = vector.load %arg4[%c1048, %c0_96] : memref<1360x128xf32, #tpu.memory_space<vmem>>, vector<1x32xf32>
    %172 = vector.broadcast %171 : vector<1x32xf32> to vector<8x32xf32>
    %173 = arith.addf %170, %172 : vector<8x32xf32>
    %cst_97 = arith.constant 0.000000e+00 : f32
    %174 = vector.broadcast %cst_97 : f32 to vector<8x32xf32>
    %175 = arith.maximumf %173, %174 : vector<8x32xf32>
    %c1056 = arith.constant 1056 : index
    %c0_98 = arith.constant 0 : index
    %176 = vector.load %arg4[%c1056, %c0_98] : memref<1360x128xf32, #tpu.memory_space<vmem>>, vector<32x64xf32>
    %cst_99 = arith.constant dense<0.000000e+00> : vector<8x64xf32>
    %177 = tpu.matmul %175, %176, %cst_99 {dimension_numbers = #tpu.dot_dimension_numbers<[1], [0], [0], [1], [0, 0, 1, 1], [], []>} : vector<8x32xf32>, vector<32x64xf32>, vector<8x64xf32> -> vector<8x64xf32>
    %178 = arith.addf %164, %177 : vector<8x64xf32>
    %c1120 = arith.constant 1120 : index
    %c0_100 = arith.constant 0 : index
    %179 = vector.load %arg4[%c1120, %c0_100] : memref<1360x128xf32, #tpu.memory_space<vmem>>, vector<1x64xf32>
    %180 = vector.broadcast %179 : vector<1x64xf32> to vector<8x64xf32>
    %181 = arith.addf %178, %180 : vector<8x64xf32>
    %c1136 = arith.constant 1136 : index
    %c0_101 = arith.constant 0 : index
    %182 = vector.load %arg4[%c1136, %c0_101] : memref<1360x128xf32, #tpu.memory_space<vmem>>, vector<1x64xf32>
    %183 = vector.broadcast %182 : vector<1x64xf32> to vector<8x64xf32>
    %184 = arith.mulf %181, %183 : vector<8x64xf32>
    %c1152 = arith.constant 1152 : index
    %c0_102 = arith.constant 0 : index
    %185 = vector.load %arg4[%c1152, %c0_102] : memref<1360x128xf32, #tpu.memory_space<vmem>>, vector<1x64xf32>
    %186 = vector.broadcast %185 : vector<1x64xf32> to vector<8x64xf32>
    %187 = arith.addf %184, %186 : vector<8x64xf32>
    %c1088 = arith.constant 1088 : index
    %c0_103 = arith.constant 0 : index
    %188 = vector.load %arg4[%c1088, %c0_103] : memref<1360x128xf32, #tpu.memory_space<vmem>>, vector<32x32xf32>
    %cst_104 = arith.constant dense<0.000000e+00> : vector<8x32xf32>
    %189 = tpu.matmul %175, %188, %cst_104 {dimension_numbers = #tpu.dot_dimension_numbers<[1], [0], [0], [1], [0, 0, 1, 1], [], []>} : vector<8x32xf32>, vector<32x32xf32>, vector<8x32xf32> -> vector<8x32xf32>
    %190 = arith.addf %165, %189 : vector<8x32xf32>
    %c1128 = arith.constant 1128 : index
    %c0_105 = arith.constant 0 : index
    %191 = vector.load %arg4[%c1128, %c0_105] : memref<1360x128xf32, #tpu.memory_space<vmem>>, vector<1x32xf32>
    %192 = vector.broadcast %191 : vector<1x32xf32> to vector<8x32xf32>
    %193 = arith.addf %190, %192 : vector<8x32xf32>
    %c1144 = arith.constant 1144 : index
    %c0_106 = arith.constant 0 : index
    %194 = vector.load %arg4[%c1144, %c0_106] : memref<1360x128xf32, #tpu.memory_space<vmem>>, vector<1x32xf32>
    %195 = vector.broadcast %194 : vector<1x32xf32> to vector<8x32xf32>
    %196 = arith.mulf %193, %195 : vector<8x32xf32>
    %c1160 = arith.constant 1160 : index
    %c0_107 = arith.constant 0 : index
    %197 = vector.load %arg4[%c1160, %c0_107] : memref<1360x128xf32, #tpu.memory_space<vmem>>, vector<1x32xf32>
    %198 = vector.broadcast %197 : vector<1x32xf32> to vector<8x32xf32>
    %199 = arith.addf %196, %198 : vector<8x32xf32>
    %c1168 = arith.constant 1168 : index
    %c0_108 = arith.constant 0 : index
    %200 = vector.load %arg4[%c1168, %c0_108] : memref<1360x128xf32, #tpu.memory_space<vmem>>, vector<64x64xf32>
    %cst_109 = arith.constant dense<0.000000e+00> : vector<8x64xf32>
    %201 = tpu.matmul %187, %200, %cst_109 {dimension_numbers = #tpu.dot_dimension_numbers<[1], [0], [0], [1], [0, 0, 1, 1], [], []>} : vector<8x64xf32>, vector<64x64xf32>, vector<8x64xf32> -> vector<8x64xf32>
    %c1232 = arith.constant 1232 : index
    %c0_110 = arith.constant 0 : index
    %202 = vector.load %arg4[%c1232, %c0_110] : memref<1360x128xf32, #tpu.memory_space<vmem>>, vector<32x64xf32>
    %cst_111 = arith.constant dense<0.000000e+00> : vector<8x64xf32>
    %203 = tpu.matmul %199, %202, %cst_111 {dimension_numbers = #tpu.dot_dimension_numbers<[1], [0], [0], [1], [0, 0, 1, 1], [], []>} : vector<8x32xf32>, vector<32x64xf32>, vector<8x64xf32> -> vector<8x64xf32>
    %204 = arith.addf %201, %203 : vector<8x64xf32>
    %c1264 = arith.constant 1264 : index
    %c0_112 = arith.constant 0 : index
    %205 = vector.load %arg4[%c1264, %c0_112] : memref<1360x128xf32, #tpu.memory_space<vmem>>, vector<1x64xf32>
    %206 = vector.broadcast %205 : vector<1x64xf32> to vector<8x64xf32>
    %207 = arith.addf %204, %206 : vector<8x64xf32>
    %c1272 = arith.constant 1272 : index
    %c0_113 = arith.constant 0 : index
    %208 = vector.load %arg4[%c1272, %c0_113] : memref<1360x128xf32, #tpu.memory_space<vmem>>, vector<64x6xf32>
    %cst_114 = arith.constant dense<0.000000e+00> : vector<8x6xf32>
    %209 = tpu.matmul %207, %208, %cst_114 {dimension_numbers = #tpu.dot_dimension_numbers<[1], [0], [0], [1], [0, 0, 1, 1], [], []>} : vector<8x64xf32>, vector<64x6xf32>, vector<8x6xf32> -> vector<8x6xf32>
    %c1336 = arith.constant 1336 : index
    %c0_115 = arith.constant 0 : index
    %210 = vector.load %arg4[%c1336, %c0_115] : memref<1360x128xf32, #tpu.memory_space<vmem>>, vector<1x6xf32>
    %211 = vector.broadcast %210 : vector<1x6xf32> to vector<8x6xf32>
    %212 = arith.addf %209, %211 : vector<8x6xf32>
    %cst_116 = arith.constant dense<0.000000e+00> : vector<8xf32>
    %213 = vector.multi_reduction <add>, %212, %cst_116 [1] : vector<8x6xf32> to vector<8xf32>
    %214 = vector.shape_cast %213 : vector<8xf32> to vector<8x1xf32>
    %cst_117 = arith.constant 6.000000e+00 : f32
    %215 = vector.broadcast %cst_117 : f32 to vector<8x1xf32>
    %216 = arith.divf %214, %215 : vector<8x1xf32>
    %217 = vector.broadcast %216 : vector<8x1xf32> to vector<8x6xf32>
    %218 = arith.subf %212, %217 : vector<8x6xf32>
    %219 = arith.mulf %218, %218 : vector<8x6xf32>
    %cst_118 = arith.constant dense<0.000000e+00> : vector<8xf32>
    %220 = vector.multi_reduction <add>, %219, %cst_118 [1] : vector<8x6xf32> to vector<8xf32>
    %221 = vector.shape_cast %220 : vector<8xf32> to vector<8x1xf32>
    %cst_119 = arith.constant 6.000000e+00 : f32
    %222 = vector.broadcast %cst_119 : f32 to vector<8x1xf32>
    %223 = arith.divf %221, %222 : vector<8x1xf32>
    %224 = vector.broadcast %216 : vector<8x1xf32> to vector<8x6xf32>
    %225 = arith.subf %212, %224 : vector<8x6xf32>
    %cst_120 = arith.constant 9.99999974E-6 : f32
    %226 = vector.broadcast %cst_120 : f32 to vector<8x1xf32>
    %227 = arith.addf %223, %226 : vector<8x1xf32>
    %228 = math.rsqrt %227 : vector<8x1xf32>
    %229 = vector.broadcast %228 : vector<8x1xf32> to vector<8x6xf32>
    %230 = arith.mulf %225, %229 : vector<8x6xf32>
    %c1344 = arith.constant 1344 : index
    %c0_121 = arith.constant 0 : index
    %231 = vector.load %arg4[%c1344, %c0_121] : memref<1360x128xf32, #tpu.memory_space<vmem>>, vector<1x6xf32>
    %232 = vector.broadcast %231 : vector<1x6xf32> to vector<8x6xf32>
    %233 = arith.mulf %230, %232 : vector<8x6xf32>
    %c1352 = arith.constant 1352 : index
    %c0_122 = arith.constant 0 : index
    %234 = vector.load %arg4[%c1352, %c0_122] : memref<1360x128xf32, #tpu.memory_space<vmem>>, vector<1x6xf32>
    %235 = vector.broadcast %234 : vector<1x6xf32> to vector<8x6xf32>
    %236 = arith.addf %233, %235 : vector<8x6xf32>
    %c0_123 = arith.constant 0 : index
    %c0_124 = arith.constant 0 : index
    %237 = vector.load %arg7[%c0_123, %c0_124] : memref<8x6xf32, #tpu.memory_space<vmem>>, vector<8x6xf32>
    tpu.vector_store %arg7[%c0_123, %c0_124], %236 {strides = array<i32>} : memref<8x6xf32, #tpu.memory_space<vmem>>, vector<8x6xf32>,
    return
  }
  func.func @transform_0(%arg0: i32) -> (i32, i32) {
    %c0_i32 = arith.constant 0 : i32
    %c0_i32_0 = arith.constant 0 : i32
    return %arg0, %c0_i32 : i32, i32
  }
  func.func @transform_1(%arg0: i32) -> (i32, i32) {
    %c0_i32 = arith.constant 0 : i32
    %c0_i32_0 = arith.constant 0 : i32
    return %arg0, %c0_i32 : i32, i32
  }
  func.func @transform_2(%arg0: i32) -> (i32, i32) {
    %c0_i32 = arith.constant 0 : i32
    %c0_i32_0 = arith.constant 0 : i32
    return %arg0, %c0_i32 : i32, i32
  }
  func.func @transform_3(%arg0: i32) -> (i32, i32) {
    %c0_i32 = arith.constant 0 : i32
    %c0_i32_0 = arith.constant 0 : i32
    %c0_i32_1 = arith.constant 0 : i32
    return %c0_i32, %c0_i32_0 : i32, i32
  }
  func.func @transform_4(%arg0: i32) -> (i32, i32) {
    %c0_i32 = arith.constant 0 : i32
    %c0_i32_0 = arith.constant 0 : i32
    %c0_i32_1 = arith.constant 0 : i32
    return %c0_i32, %c0_i32_0 : i32, i32
  }
  func.func @transform_5(%arg0: i32) -> (i32, i32, i32) {
    %c0_i32 = arith.constant 0 : i32
    %c0_i32_0 = arith.constant 0 : i32
    %c0_i32_1 = arith.constant 0 : i32
    %c0_i32_2 = arith.constant 0 : i32
    return %c0_i32, %c0_i32_0, %c0_i32_1 : i32, i32, i32
  }
  func.func @transform_6(%arg0: i32) -> (i32, i32) {
    %c0_i32 = arith.constant 0 : i32
    %c0_i32_0 = arith.constant 0 : i32
    return %arg0, %c0_i32 : i32, i32
  }
}

</mosaic_0001>

<bundles_post_ra>
// kernel: ts_mixer_forward.1
= control target key start
LH: loop header
LB: loop body
LE: loop exit
PB: predicated region body
PF: predicated region fallthrough
CT: control target
= control target key end

     0   :  { %11 = vsyncpa [#allocation3], 0  ;;  %s3984_s21 = smov 0   ;;  %s4267_s0 = inlined_call_operand.vmem [shape: f32[32,3], index: 0, kind: input, shape index: {}]   ;;  %s4268_s1 = inlined_call_operand.vmem [shape: f32[16,5], index: 1, kind: input, shape index: {}]   ;;  %s4269_s2 = inlined_call_operand.vmem [shape: f32[16,4], index: 2, kind: input, shape index: {}]   ;;  %s4270_s3 = inlined_call_operand.hbm [shape: f32[1360,128], index: 3, kind: input, shape index: {}]   ;;  %s4271_s4 = inlined_call_operand.vmem [shape: f32[8,16], index: 4, kind: input, shape index: {}]   ;;  %s4272_s5 = inlined_call_operand.vmem [shape: f32[2,8,8], index: 5, kind: input, shape index: {}]   ;;  %s4273_s6 = inlined_call_operand.vmem [shape: f32[16,6], index: 6, kind: output, shape index: {}]  }
   0x1 LB: > { %s3990_s22 = sadd.s32 4294967295, %s3938_s21   ;;  %p3073_p0 = scmp.ge.s32.totalorder %s3938_s21, 1  ;;  %s3938_s21 = sphi %s3984_s21, %s17_s21  }
   0x2   : > { %p189_p1 = scmp.lt.s32.totalorder %s3938_s21, 3  ;;  %s3940_s23 = smov [#allocation2]  }
   0x3   : > { %s201_s24 = sshll.u32 %s3940_s23, 4  ;;  %p4274_p3 = scmp.eq.s32.totalorder %s3990_s22, 0  ;;  %s202_s24 = int_to_ptr.vmem [resolvable:$true] %s201_s24 }
   0x4   : > { %p3994_p2 = pnand %p3073_p0, %p189_p1  ;;  %s3900_s29 = scalar_lea.hbm %s4270_s3, 21760 }
   0x5   : > { %p3901_p6 = scmp.ne.s32.totalorder %s4270_s3, %s3900_s29  ;;  %p3907_p10 = scmp.lt.u32.totalorder %s3900_s29, %s4270_s3 }
   0x6   : > { %s4276_s25 = scalar_select %p3994_p2, 1, 0 }
   0x7   : > { %p3875_p4 = pneg %p3994_p2 }
   0x9   : > { %p4003_p5 = pnand %p4274_p3, %p3875_p4 }
   0xb   : > { %p3902_p7 = pneg %p4003_p5 }
   0xd   : > { %p3903_p8 = pnand %p3902_p7, %p3901_p6 }
   0xf   : > { %p3904_p9 = pneg %p3903_p8 }
  0x11   : > { %p3909_p11 = pnand %p3907_p10, %p3904_p9 }
  0x13   : > { %3912 = shalt.err (!%p3909_p11)
}
  0x14   : > { %s3913_s10 = scalar_lea.vmem %s202_s24, 21760  ;;  %p3921_p1 = scmp.lt.s32.totalorder %s202_s24, %s202_s24 }
  0x15   : > { %p3914_p12 = scmp.ne.s32.totalorder %s202_s24, %s3913_s10  ;;  %p3922_p4 = scmp.lt.s32.totalorder %s3913_s10, %s3913_s10 }
  0x17   : > { %p3916_p13 = pnand %p3914_p12, %p3902_p7  ;;  %p3923_p3 = por %p3922_p4, %p3921_p1 }
  0x19   : > { %p3917_p0 = pneg %p3916_p13 }
  0x1b   : > { %p3924_p2 = pnand %p3923_p3, %p3917_p0 }
  0x1d   : > { %3927 = shalt.err (!%p3924_p2)
}
  0x1e   : > { %s3941_s11 = smov 128   ;;  %s3942_s12 = smov 8  }
  0x1f   : > { %3878 = dma.hbm_to_vmem [thread:$0]  (!%p4003_p5), %s4270_s3, 21760, %s202_s24, [#allocation3], %s3941_s11, %s3941_s11, %s3942_s12  }
  0x20   : > { %p4278_p6 = scmp.ne.s32.totalorder %s4276_s25, 0 }
  0x21   : > { %p4279_p8 = scmp.eq.s32.totalorder (!%p4278_p6), %s3990_s22, 0 }
  0x22   : > { %246 = sbr.rel (%p4278_p6) target bundleno = 4167 (0x1047), region = 44 }
  0x29   : > { %3933 = dma.done.wait (%p4279_p8), [#allocation3], 21760   ;;  %p4280_p7 = pmov %p4279_p8 }
  0x2a   : > { %p289_p2 = scmp.lt.s32.totalorder %s3990_s22, 1  ;;  %v3943_v0 = vmov 0.0   ;;  %vm3944_vm0 = vmmov 0   ;;  %v3945_v1 = vmov 0.0|0.0   ;;  %vm391_vm1 = vcmask 1043456   ;;  %v466_v4 = vld [vmem:[#allocation2 + $0x20] sm:$0xff] }
  0x2b   : > { %3935 = vsyncadd (%p4280_p7), [#allocation3], 4294945536  ;;  %3324 = vmatprep.subr.mxu1 %v3943_v0  ;;  %3326 = vmatprep.mubr.msk.f32.mxu1 %vm3944_vm0, %v3943_v0  ;;  %vm387_vm2 = vcmask 31744   ;;  %v381_v2 = vld [vmem:[#allocation2 + $0x10] sm:$0xf]  ;;  %v467_v5 = vld [vmem:[#allocation2 + $0x28] sm:$0xff] }
  0x2c   : > { %s290_s15 = scalar_select %p289_p2, %s3990_s22, 1  ;;  %3670 = vmatprep.subr.bf16.mxu0 %v3945_v1  ;;  %3321 = vmatprep.mubr.msk.f32.mxu0 %vm3944_vm0, %v3943_v0  ;;  %v468_v6 = vld [vmem:[#allocation2 + $0x30] sm:$0xff]  ;;  %v469_v7 = vld [vmem:[#allocation2 + $0x38] sm:$0xff]  ;;  %v3674_v8 = vpack.c.bf16 %v467_v5, %v466_v4  ;;  %v470_v10 = vld [vmem:[#allocation2 + $0x40] sm:$0xff]  ;;  %vm307_vm3 = vcmask 130048   ;;  %vm732_vm4 = vcmask 1042432  }
  0x2d   : > { %3325 = vmatpush3.msk.msra.mxu1 %vm391_vm1, %v381_v2  ;;  %v3677_v9 = vpack.c.bf16 %v469_v7, %v468_v6  ;;  %v471_v11 = vld [vmem:[#allocation2 + $0x48] sm:$0xff]  ;;  %v472_v13 = vld [vmem:[#allocation2 + $0x50] sm:$0xff]  ;;  %v473_v14 = vld [vmem:[#allocation2 + $0x58] sm:$0xff]  ;;  %s3078_s20 = sshll.u32 %s3990_s22, 1  ;;  %vm728_vm5 = vcmask 23552   ;;  %vm654_vm6 = vcmask 261120  }
  0x2e   : > { %s4037_s16 = sshll.u32 %s290_s15, 3  ;;  %3673 = vmatprep.subr.bf16.mxu1 %v3945_v1  ;;  %v3680_v12 = vpack.c.bf16 %v471_v11, %v470_v10  ;;  %v3683_v15 = vpack.c.bf16 %v473_v14, %v472_v13  ;;  %v474_v16 = vld [vmem:[#allocation2 + $0x60] sm:$0xff]  ;;  %v475_v17 = vld [vmem:[#allocation2 + $0x68] sm:$0xff]  ;;  %v476_v19 = vld [vmem:[#allocation2 + $0x70] sm:$0xff]  ;;  %p284_p3 = scmp.lt.s32.totalorder %s3078_s20, 3  ;;  %vm1145_vm7 = vcmask 1044480  }
  0x2f   : > { %s296_s19 = scalar_lea.vmem %s4269_s2, %s4037_s16  ;;  %v3686_v18 = vpack.c.bf16 %v475_v17, %v474_v16  ;;  %v477_v20 = vld [vmem:[#allocation2 + $0x78] sm:$0xff]  ;;  %v478_v22 = vld [vmem:[#allocation2 + $0x80] sm:$0xff]  ;;  %v479_v23 = vld [vmem:[#allocation2 + $0x88] sm:$0xff]  ;;  %s3946_s22 = smov 96   ;;  %vm1141_vm8 = vcmask 39936   ;;  %vm1631_vm9 = vcmask 64512  }
  0x30   : > { %v4043_v3 = vld [vmem:[%s296_s19] sm:$0xff]  ;;  %v3689_v21 = vpack.c.bf16 %v477_v20, %v476_v19  ;;  %v3692_v24 = vpack.c.bf16 %v479_v23, %v478_v22  ;;  %v480_v25 = vld [vmem:[#allocation2 + $0x90] sm:$0xff]  ;;  %v481_v26 = vld [vmem:[#allocation2 + $0x98] sm:$0xff]  ;;  %s4282_s20 = smov (!%p284_p3, %s3078_s20), 3  ;;  %s3947_s29 = smov 64   ;;  %vm1797_vm10 = vcmask 523264  }
  0x31   : > { %3327 = vmatmul.mubr.msk.f32.vlgmr.msra.gmra.mrb[0].mxu1 %vm387_vm2, %v4043_v3  ;;  %v3695_v27 = vpack.c.bf16 %v481_v26, %v480_v25  ;;  %s3079_s23 = sshll.u32 %s4282_s20, 3  ;;  %v303_v31 = vld [vmem:[%s4271_s4] sm:$0xff]  ;;  %v3084_v32 = vld [vmem:[#allocation2 + $0x18] ss:$0 sm:$0xff]  ;;  %v557_v37 = vld [vmem:[#allocation2 + $0xa8] sm:$0xf]  ;;  %s292_s8 = scalar_lea.vmem %s4268_s1, %s4037_s16 }
  0x32   : > { %3361 = vmatprep.mubr.msk.f32.mxu1 %vm3944_vm0, %v3943_v0  ;;  %3675 = vmatpush3.bf16.msra.mxu1 %v3674_v8  ;;  %s287_s26 = scalar_lea.vmem %s4267_s0, %s3079_s23  ;;  %v650_v38 = vld [vmem:[#allocation2 + $0xd0] sm:$0xff]  ;;  %v651_v39 = vld [vmem:[#allocation2 + $0xd8] sm:$0xff]  ;;  %v652_v41 = vld [vmem:[#allocation2 + $0xe0] sm:$0xff]  ;;  %s3948_s11 = smov 32   ;;  %vm2954_vm11 = vcmask 48128  }
  0x33   : > { %3676 = vmatprep.subr.bf16.mxu1 %v3945_v1  ;;  %v304_v28 = vld [vmem:[%s287_s26] sm:$0xff]  ;;  %v305_v29 = vld [vmem:[%s287_s26 + $0x8] sm:$0xff]  ;;  %v3698_v40 = vpack.c.bf16 %v651_v39, %v650_v38  ;;  %v3088_v50 = vld [vmem:[#allocation2 + $0xb0] ss:$0 sm:$0xff]  ;;  %s300_s17 = scalar_lea.vmem %s4273_s6, %s4037_s16 }
  0x34   : > { %v3671_v30 = vpack.c.bf16 %v305_v29, %v304_v28  ;;  %v653_v42 = vld [vmem:[#allocation2 + $0xe8] sm:$0xff]  ;;  %v3087_v49 = vld [vmem:[#allocation2 + $0xa0] ss:$0 sm:$0xff]  ;;  %v3091_v53 = vld [vmem:[#allocation2 + $0xb8] ss:$0 sm:$0xff] }
  0x35   : > { %v3701_v43 = vpack.c.bf16 %v653_v42, %v652_v41  ;;  %v306_v44 = vld [vmem:[#allocation2 + $0x8] sm:$0xff]  ;;  %v3853_v51 = vadd.f32 %v3088_v50, %v3087_v49  ;;  %v3092_v56 = vld [vmem:[#allocation2 + $0xc0] ss:$0 sm:$0xff]  ;;  %v813_v59 = vld [vmem:[#allocation2 + $0xf8] sm:$0xff] }
  0x36   : > { %3678 = vmatpush3.bf16.msra.mxu1 %v3677_v9  ;;  %3672 = vmatpush3.bf16.msra.mxu0 %v3671_v30  ;;  %v649_v48 = vld [vmem:[#allocation2 + $0xc8] sm:$0x7]  ;;  %v814_v60 = vld [vmem:[#allocation2 + $0x100] sm:$0xff]  ;;  %v3096_v8 = vld [vmem:[#allocation2 + $0xf0] ss:$0 sm:$0xff] }
  0x37   : > { %3679 = vmatprep.subr.bf16.mxu1 %v3945_v1  ;;  %3697 = vmatprep.subr.bf16.mxu0 %v3945_v1  ;;  %v3704_v61 = vpack.c.bf16 %v814_v60, %v813_v59  ;;  %v815_v2 = vld [vmem:[#allocation2 + $0x108] sm:$0xff]  ;;  %v1062_v5 = vld [vmem:[#allocation2 + $0x160] sm:$0x1f]  ;;  %v898_v16 = vld [vmem:[#allocation2 + $0x138] sm:$0xff] }
  0x38   : > { %v4104_v6 = vld [vmem:[%s292_s8] sm:$0xff]  ;;  %v896_v11 = vld [vmem:[#allocation2 + $0x128] sm:$0xff]  ;;  %v1065_v23 = vld [vmem:[#allocation2 + $0x178] sm:$0xff] }
  0x39   : > { %3322 = vmatmul.mubr.msk.f32.vlgmr.msra.gmra.mrb[0].mxu0 %vm307_vm3, %v303_v31  ;;  %v899_v17 = vld [vmem:[#allocation2 + $0x140] sm:$0xff]  ;;  %v1063_v20 = vld [vmem:[#allocation2 + $0x168] sm:$0xff]  ;;  %v1227_v28 = vld [vmem:[#allocation2 + $0x198] sm:$0xff] }
  0x3a   : > { %3681 = vmatpush3.bf16.msra.mxu1 %v3680_v12  ;;  %3377 = vmatprep.mubr.msk.f32.mxu0 %vm3944_vm0, %v3943_v0  ;;  %v897_v12 = vld [vmem:[#allocation2 + $0x130] sm:$0xff]  ;;  %v895_v19 = vld [vmem:[#allocation2 + $0x120] sm:$0x7]  ;;  %v3108_v38 = vld [vmem:[#allocation2 + $0x188] ss:$0 sm:$0xff] }
  0x3b   : > { %3682 = vmatprep.subr.bf16.mxu1 %v3945_v1  ;;  %3699 = vmatpush3.bf16.msra.mxu0 %v3698_v40  ;;  %v3710_v14 = vpack.c.bf16 %v897_v12, %v896_v11  ;;  %v1309_v41 = vld [vmem:[#allocation2 + $0x1c0] sm:$0xff]  ;;  %v1310_v42 = vld [vmem:[#allocation2 + $0x1c8] sm:$0xff]  ;;  %v1308_v49 = vld [vmem:[#allocation2 + $0x1b8] sm:$0x1f] }
  0x3c   : > { %3700 = vmatprep.subr.bf16.mxu0 %v3945_v1  ;;  %v1719_v50 = vld [vmem:[#allocation2 + $0x298] sm:$0xff]  ;;  %v1480_v59 = vld [vmem:[#allocation2 + $0x220] sm:$0xff] }
  0x3d   : > { %v1475_v11 = vld [vmem:[#allocation2 + $0x1f8] sm:$0xff]  ;;  %v1476_v12 = vld [vmem:[#allocation2 + $0x200] sm:$0xff] }
  0x3e   : > { %3684 = vmatpush3.bf16.msra.mxu1 %v3683_v15 }
  0x3f   : > { %3685 = vmatprep.subr.bf16.mxu1 %v3945_v1  ;;  %3702 = vmatpush3.bf16.msra.mxu0 %v3701_v43 }
  0x40   : > { %3703 = vmatprep.subr.bf16.mxu0 %v3945_v1 }
  0x42   : > { %3687 = vmatpush3.bf16.msra.mxu1 %v3686_v18  ;;  %v3713_v18 = vpack.c.bf16 %v899_v17, %v898_v16  ;;  %v3740_v16 = vpack.c.bf16 %v1476_v12, %v1475_v11  ;;  %v2084_v11 = vld [vmem:[#allocation2 + $0x338] sm:$0xff] }
  0x43   : > { %3688 = vmatprep.subr.bf16.mxu1 %v3945_v1 }
  0x46   : > { %3690 = vmatpush3.bf16.msra.mxu1 %v3689_v21  ;;  %v1064_v21 = vld [vmem:[#allocation2 + $0x170] sm:$0xff] }
  0x47   : > { %3691 = vmatprep.subr.bf16.mxu1 %v3945_v1  ;;  %v3716_v22 = vpack.c.bf16 %v1064_v21, %v1063_v20  ;;  %v1478_v20 = vld [vmem:[#allocation2 + $0x210] sm:$0xff] }
  0x48   : > { %v3103_v21 = vld [vmem:[#allocation2 + $0x150] ss:$0 sm:$0xff] }
  0x4a   : > { %3693 = vmatpush3.bf16.msra.mxu1 %v3692_v24  ;;  %v1066_v24 = vld [vmem:[#allocation2 + $0x180] sm:$0xff] }
  0x4b   : > { %3694 = vmatprep.subr.bf16.mxu1 %v3945_v1  ;;  %v3719_v25 = vpack.c.bf16 %v1066_v24, %v1065_v23 }
  0x4e   : > { %3696 = vmatpush3.bf16.msra.mxu1 %v3695_v27  ;;  %v1226_v27 = vld [vmem:[#allocation2 + $0x190] sm:$0xff] }
  0x4f   : > { %3364 = vmatprep.subr.mxu1 %v3943_v0  ;;  %v3722_v29 = vpack.c.bf16 %v1227_v28, %v1226_v27  ;;  %v1711_v28 = vld [vmem:[#allocation2 + $0x258] sm:$0xff] }
 0x104   : > { %v461_v33 = vpop.f32.mrb[0].mxu1 }
 0x105   : > { %v462_v34 = vadd.f32 %v3084_v32, %v461_v33  ;;  %v3328_v35 = vpop.f32.mrb[1].mxu1  ;;  %v1228_v32 = vld [vmem:[#allocation2 + $0x1a0] sm:$0xff]  ;;  %v1229_v33 = vld [vmem:[#allocation2 + $0x1a8] sm:$0xff] }
 0x107   : > { %v465_v36 = vmax.f32 %v462_v34, 0.0  ;;  %v3725_v34 = vpack.c.bf16 %v1229_v33, %v1228_v32 }
 0x109   : > { %3362 = vmatmul.mubr.f32.vlgmr.msra.gmra.mrb[2].mxu1 %v465_v36 }
 0x10a   : > { %3365 = vmatpush3.msk.msra.mxu1 %vm391_vm1, %v557_v37  ;;  %3366 = vmatprep.mubr.msk.f32.mxu1 %vm3944_vm0, %v3943_v0 }
 0x10b   : > { %3380 = vmatprep.subr.mxu1 %v3943_v0 }
 0x10c   : > { %v377_v45 = vpop.f32.mrb[0].mxu0 }
 0x10d   : > { %v4078_v46 = vadd.f32 %v377_v45, %v306_v44  ;;  %v3323_v47 = vpop.f32.mrb[1].mxu0  ;;  %v3728_v44 = vpack.c.bf16 %v1310_v42, %v1309_v41  ;;  %v1718_v41 = vld [vmem:[#allocation2 + $0x290] sm:$0xff] }
 0x10e   : > { %v1312_v47 = vld [vmem:[#allocation2 + $0x1d8] sm:$0xff] }
 0x111   : > { %3367 = vmatmul.mubr.msk.f32.vlgmr.msra.gmra.mrb[2].mxu1 %vm387_vm2, %v4043_v3  ;;  %v816_v3 = vld [vmem:[#allocation2 + $0x110] sm:$0xff] }
 0x112   : > { %3382 = vmatprep.mubr.msk.f32.mxu1 %vm3944_vm0, %v3943_v0  ;;  %3381 = vmatpush3.msk.msra.mxu1 %vm732_vm4, %v649_v48  ;;  %v3707_v4 = vpack.c.bf16 %v816_v3, %v815_v2  ;;  %v3109_v2 = vld [vmem:[#allocation2 + $0x1b0] ss:$0 sm:$0xff]  ;;  %v3097_v3 = vld [vmem:[#allocation2 + $0x118] ss:$0 sm:$0xff] }
 0x113   : > { %3423 = vmatprep.subr.mxu1 %v3943_v0 }
 0x115   : > { %3383 = vmatmul.mubr.msk.f32.vlgmr.msra.gmra.mrb[4].mxu1 %vm728_vm5, %v4078_v46 }
 0x116   : > { %3425 = vmatprep.mubr.msk.f32.mxu1 %vm3944_vm0, %v3943_v0  ;;  %3424 = vmatpush3.msk.msra.mxu1 %vm1145_vm7, %v1062_v5  ;;  %v3114_v5 = vld [vmem:[#allocation2 + $0x1e0] ss:$0 sm:$0xff] }
 0x117   : > { %3721 = vmatprep.subr.bf16.mxu1 %v3945_v1 }
 0x119   : > { %3426 = vmatmul.mubr.msk.f32.vlgmr.msra.gmra.mrb[6].mxu1 %vm1141_vm8, %v4104_v6 }
 0x11a   : > { %3436 = vmatprep.mubr.msk.f32.mxu1 %vm3944_vm0, %v3943_v0  ;;  %3723 = vmatpush3.bf16.msra.mxu1 %v3722_v29  ;;  %v1712_v29 = vld [vmem:[#allocation2 + $0x260] sm:$0xff] }
 0x11b   : > { %3724 = vmatprep.subr.bf16.mxu1 %v3945_v1 }
 0x11e   : > { %3726 = vmatpush3.bf16.msra.mxu1 %v3725_v34  ;;  %v1713_v34 = vld [vmem:[#allocation2 + $0x268] sm:$0xff] }
 0x11f   : > { %3727 = vmatprep.subr.bf16.mxu1 %v3945_v1 }
 0x1e4   : > { %v632_v52 = vpop.f32.mrb[2].mxu1 }
 0x1e5   : > { %v3854_v54 = vadd.f32 %v3853_v51, %v632_v52  ;;  %v3368_v55 = vpop.f32.mrb[3].mxu1  ;;  %v1720_v51 = vld [vmem:[#allocation2 + $0x2a0] sm:$0xff] }
 0x1e6   : > { %v3746_v52 = vpack.c.bf16 %v1720_v51, %v1719_v50  ;;  %v1707_v51 = vld [vmem:[#allocation2 + $0x248] sm:$0xff] }
 0x1e7   : > { %v642_v57 = vmul.f32 %v3854_v54, %v3091_v53  ;;  %v1721_v53 = vld [vmem:[#allocation2 + $0x2a8] sm:$0xff]  ;;  %v1722_v54 = vld [vmem:[#allocation2 + $0x2b0] sm:$0xff] }
 0x1e8   : > { %v802_v62 = vpop.f32.mrb[4].mxu1  ;;  %v3749_v55 = vpack.c.bf16 %v1722_v54, %v1721_v53  ;;  %v1709_v53 = vld [vmem:[#allocation2 + $0x250] sm:$0xff] }
 0x1e9   : > { %v4087_v58 = vadd.f32 %v3092_v56, %v642_v57  ;;  %v3384_v63 = vpop.f32.mrb[5].mxu1  ;;  %v1479_v57 = vld [vmem:[#allocation2 + $0x218] sm:$0xff] }
 0x1ea   : > { %v3734_v60 = vpack.c.bf16 %v1480_v59, %v1479_v57  ;;  %v1881_v57 = vld [vmem:[#allocation2 + $0x2d8] sm:$0xff] }
 0x1eb   : > { %1067 = vrot.lane.b32.xlu0 %v4087_v58, %s3946_s22  ;;  %3378 = vmatmul.mubr.msk.f32.vlgmr.msra.gmra.mrb[2].mxu0 %vm654_vm6, %v4087_v58 }
 0x1ec   : > { %3393 = vmatprep.mubr.msk.f32.mxu0 %vm3944_vm0, %v3943_v0  ;;  %3705 = vmatpush3.bf16.msra.mxu0 %v3704_v61  ;;  %v1215_v30 = vpop.f32.mrb[6].mxu1  ;;  %v1481_v61 = vld [vmem:[#allocation2 + $0x228] sm:$0xff] }
 0x1ed   : > { %3706 = vmatprep.subr.bf16.mxu0 %v3945_v1  ;;  %v3427_v31 = vpop.f32.mrb[7].mxu1 }
 0x1ee   : > { %v3752_v31 = vpack.c.bf16 %v1712_v29, %v1711_v28  ;;  %v3126_v29 = vld [vmem:[#allocation2 + $0x320] ss:$0 sm:$0xff] }
 0x1ef   : > { %1723 = vrot.lane.b32.xlu0 %v4087_v58, %s3947_s29 }
 0x1f0   : > { %3708 = vmatpush3.bf16.msra.mxu0 %v3707_v4 }
 0x1f1   : > { %3709 = vmatprep.subr.bf16.mxu0 %v3945_v1 }
 0x25d   : > { %v1068_v26 = vpop.permute.xlu0 %1067 }
 0x261   : > { %v1724_v56 = vpop.permute.xlu0 %1723 }
 0x2be   : > { %v724_v7 = vpop.f32.mrb[2].mxu0 }
 0x2bf   : > { %v803_v9 = vadd.f32 %v802_v62, %v724_v7  ;;  %v3379_v10 = vpop.f32.mrb[3].mxu0  ;;  %v1482_v62 = vld [vmem:[#allocation2 + $0x230] sm:$0xff] }
 0x2c0   : > { %v3737_v63 = vpack.c.bf16 %v1482_v62, %v1481_v61  ;;  %v3122_v61 = vld [vmem:[#allocation2 + $0x2b8] ss:$0 sm:$0xff] }
 0x2c1   : > { %v811_v13 = vadd.f32 %v3096_v8, %v803_v9  ;;  %v3115_v8 = vld [vmem:[#allocation2 + $0x1e8] ss:$0 sm:$0xff] }
 0x2c3   : > { %v812_v15 = vmax.f32 %v811_v13, 0.0  ;;  %v3102_v13 = vld [vmem:[#allocation2 + $0x148] ss:$0 sm:$0xff] }
 0x2c5   : > { %3394 = vmatmul.mubr.msk.f32.vlgmr.msra.gmra.mrb[4].mxu0 %vm654_vm6, %v812_v15 }
 0x2c6   : > { %3711 = vmatpush3.bf16.msra.mxu0 %v3710_v14  ;;  %3404 = vmatprep.mubr.msk.f32.mxu0 %vm3944_vm0, %v3943_v0  ;;  %v3116_v14 = vld [vmem:[#allocation2 + $0x1f0] ss:$0 sm:$0xff] }
 0x2c7   : > { %3712 = vmatprep.subr.bf16.mxu0 %v3945_v1 }
 0x2ca   : > { %3714 = vmatpush3.bf16.msra.mxu0 %v3713_v18 }
 0x2cb   : > { %3407 = vmatprep.subr.mxu0 %v3943_v0 }
 0x2cd   : > { %3405 = vmatmul.mubr.msk.f32.vlgmr.msra.gmra.mrb[4].mxu0 %vm654_vm6, %v4087_v58 }
 0x2ce   : > { %3408 = vmatpush3.msk.msra.mxu0 %vm732_vm4, %v895_v19  ;;  %3409 = vmatprep.mubr.msk.f32.mxu0 %vm3944_vm0, %v3943_v0  ;;  %v1477_v19 = vld [vmem:[#allocation2 + $0x208] sm:$0xff] }
 0x2cf   : > { %3715 = vmatprep.subr.bf16.mxu0 %v3945_v1  ;;  %v3743_v24 = vpack.c.bf16 %v1478_v20, %v1477_v19  ;;  %v2089_v19 = vld [vmem:[#allocation2 + $0x360] sm:$0xff]  ;;  %v2090_v20 = vld [vmem:[#allocation2 + $0x368] sm:$0xff] }
 0x2d5   : > { %3410 = vmatmul.mubr.msk.f32.vlgmr.msra.gmra.mrb[4].mxu0 %vm728_vm5, %v4078_v46  ;;  %v1311_v46 = vld [vmem:[#allocation2 + $0x1d0] sm:$0xff] }
 0x2d6   : > { %3717 = vmatpush3.bf16.msra.mxu0 %v3716_v22  ;;  %3420 = vmatprep.mubr.msk.f32.mxu0 %vm3944_vm0, %v3943_v0  ;;  %v3731_v48 = vpack.c.bf16 %v1312_v47, %v1311_v46  ;;  %v1630_v46 = vld [vmem:[#allocation2 + $0x240] sm:$0xff] }
 0x2d7   : > { %3718 = vmatprep.subr.bf16.mxu0 %v3945_v1 }
 0x2da   : > { %3720 = vmatpush3.bf16.msra.mxu0 %v3719_v25 }
 0x2db   : > { %3733 = vmatprep.subr.bf16.mxu0 %v3945_v1 }
 0x2dd   : > { %3421 = vmatmul.mubr.msk.f32.vlgmr.msra.gmra.mrb[6].mxu0 %vm654_vm6, %v1068_v26 }
 0x2de   : > { %3463 = vmatprep.mubr.msk.f32.mxu0 %vm3944_vm0, %v3943_v0  ;;  %3735 = vmatpush3.bf16.msra.mxu0 %v3734_v60 }
 0x2df   : > { %3736 = vmatprep.subr.bf16.mxu0 %v3945_v1 }
 0x2e2   : > { %3738 = vmatpush3.bf16.msra.mxu0 %v3737_v63 }
 0x2e3   : > { %3739 = vmatprep.subr.bf16.mxu0 %v3945_v1 }
 0x3a8   : > { %v1039_v35 = vpop.f32.mrb[4].mxu0 }
 0x3a9   : > { %v3411_v36 = vpop.f32.mrb[5].mxu0  ;;  %v3855_v9 = vadd.f32 %v3097_v3, %v1039_v35  ;;  %v1714_v35 = vld [vmem:[#allocation2 + $0x270] sm:$0xff]  ;;  %v1975_v3 = vld [vmem:[#allocation2 + $0x2e8] sm:$0xff] }
 0x3aa   : > { %v3755_v36 = vpack.c.bf16 %v1714_v35, %v1713_v34  ;;  %v3128_v34 = vld [vmem:[#allocation2 + $0x308] ss:$0 sm:$0xff] }
 0x3ab   : > { %v3856_v17 = vadd.f32 %v3855_v9, %v3102_v13  ;;  %v2085_v13 = vld [vmem:[#allocation2 + $0x340] sm:$0xff]  ;;  %v3130_v35 = vld [vmem:[#allocation2 + $0x328] ss:$0 sm:$0xff] }
 0x3ad   : > { %v1055_v25 = vmul.f32 %v3856_v17, %v3103_v21  ;;  %v2088_v17 = vld [vmem:[#allocation2 + $0x358] sm:$0xff]  ;;  %v3791_v21 = vpack.c.bf16 %v2090_v20, %v2089_v19  ;;  %v2251_v20 = vld [vmem:[#allocation2 + $0x3a0] sm:$0xff] }
 0x3b0   : > { %v1137_v37 = vpop.f32.mrb[6].mxu0 }
 0x3b1   : > { %v1216_v39 = vadd.f32 %v1215_v30, %v1137_v37  ;;  %v3422_v40 = vpop.f32.mrb[7].mxu0  ;;  %v1629_v30 = vld [vmem:[%s4272_s5] sm:$0xff]  ;;  %v1715_v37 = vld [vmem:[#allocation2 + $0x278] sm:$0xff] }
 0x3b2   : > { %v1717_v40 = vld [vmem:[#allocation2 + $0x288] sm:$0xff] }
 0x3b3   : > { %v1224_v43 = vadd.f32 %v3108_v38, %v1216_v39  ;;  %v1716_v38 = vld [vmem:[#allocation2 + $0x280] sm:$0xff]  ;;  %v3761_v42 = vpack.c.bf16 %v1718_v41, %v1717_v40  ;;  %v2094_v40 = vld [vmem:[#allocation2 + $0x388] sm:$0xff] }
 0x3b4   : > { %v3758_v39 = vpack.c.bf16 %v1716_v38, %v1715_v37  ;;  %v2092_v37 = vld [vmem:[#allocation2 + $0x378] sm:$0xff]  ;;  %v2093_v38 = vld [vmem:[#allocation2 + $0x380] sm:$0xff] }
 0x3b5   : > { %v1225_v45 = vmax.f32 %v1224_v43, 0.0  ;;  %v1878_v43 = vld [vmem:[#allocation2 + $0x2c0] sm:$0xff]  ;;  %v3779_v41 = vpack.c.bf16 %v2094_v40, %v2093_v38  ;;  %v2594_v40 = vld [vmem:[#allocation2 + $0x448] sm:$0xff] }
 0x3b7   : > { %3437 = vmatmul.mubr.msk.f32.vlgmr.msra.gmra.mrb[8].mxu1 %vm654_vm6, %v1225_v45 }
 0x3b8   : > { %3729 = vmatpush3.bf16.msra.mxu1 %v3728_v44  ;;  %3447 = vmatprep.mubr.msk.f32.mxu1 %vm3944_vm0, %v3943_v0  ;;  %v1879_v44 = vld [vmem:[#allocation2 + $0x2c8] sm:$0xff] }
 0x3b9   : > { %3730 = vmatprep.subr.bf16.mxu1 %v3945_v1  ;;  %v3764_v45 = vpack.c.bf16 %v1879_v44, %v1878_v43 }
 0x3bc   : > { %3732 = vmatpush3.bf16.msra.mxu1 %v3731_v48 }
 0x3bd   : > { %3450 = vmatprep.subr.mxu1 %v3943_v0 }
 0x3bf   : > { %3448 = vmatmul.mubr.msk.f32.vlgmr.msra.gmra.mrb[8].mxu1 %vm654_vm6, %v1068_v26  ;;  %v3104_v26 = vld [vmem:[#allocation2 + $0x158] ss:$0 sm:$0xff] }
 0x3c0   : > { %3451 = vmatpush3.msk.msra.mxu1 %vm1145_vm7, %v1308_v49  ;;  %3452 = vmatprep.mubr.msk.f32.mxu1 %vm3944_vm0, %v3943_v0  ;;  %v1061_v27 = vadd.f32 %v3104_v26, %v1055_v25 }
 0x3c1   : > { %3745 = vmatprep.subr.bf16.mxu1 %v3945_v1 }
 0x3c7   : > { %3453 = vmatmul.mubr.msk.f32.vlgmr.msra.gmra.mrb[8].mxu1 %vm1141_vm8, %v4104_v6 }
 0x3c8   : > { %3747 = vmatpush3.bf16.msra.mxu1 %v3746_v52  ;;  %3490 = vmatprep.mubr.msk.f32.mxu1 %vm3944_vm0, %v3943_v0 }
 0x3c9   : > { %3748 = vmatprep.subr.bf16.mxu1 %v3945_v1 }
 0x3cc   : > { %3750 = vmatpush3.bf16.msra.mxu1 %v3749_v55 }
 0x3cd   : > { %3763 = vmatprep.subr.bf16.mxu1 %v3945_v1 }
 0x3cf   : > { %3491 = vmatmul.mubr.msk.f32.vlgmr.msra.gmra.mrb[10].mxu1 %vm654_vm6, %v1724_v56  ;;  %v1880_v56 = vld [vmem:[#allocation2 + $0x2d0] sm:$0xff] }
 0x3d0   : > { %3520 = vmatprep.mubr.msk.f32.mxu1 %vm3944_vm0, %v3943_v0  ;;  %3765 = vmatpush3.bf16.msra.mxu1 %v3764_v45  ;;  %v3767_v59 = vpack.c.bf16 %v1881_v57, %v1880_v56  ;;  %v2340_v56 = vld [vmem:[#allocation2 + $0x400] sm:$0xff] }
 0x3d1   : > { %3766 = vmatprep.subr.bf16.mxu1 %v3945_v1 }
 0x3d4   : > { %3768 = vmatpush3.bf16.msra.mxu1 %v3767_v59 }
 0x3d5   : > { %3769 = vmatprep.subr.bf16.mxu1 %v3945_v1 }
 0x49a   : > { %v1452_v4 = vpop.f32.mrb[8].mxu1 }
 0x49b   : > { %v3857_v6 = vadd.f32 %v3109_v2, %v1452_v4  ;;  %v3454_v7 = vpop.f32.mrb[9].mxu1  ;;  %v1974_v2 = vld [vmem:[#allocation2 + $0x2e0] sm:$0xff] }
 0x49c   : > { %v1976_v7 = vld [vmem:[#allocation2 + $0x2f0] sm:$0xff] }
 0x49d   : > { %v3858_v10 = vadd.f32 %v3857_v6, %v3114_v5  ;;  %v3770_v5 = vpack.c.bf16 %v1975_v3, %v1974_v2  ;;  %v2342_v2 = vld [vmem:[#allocation2 + $0x410] sm:$0xff] }
 0x49f   : > { %v1468_v15 = vmul.f32 %v3858_v10, %v3115_v8  ;;  %v1977_v8 = vld [vmem:[#allocation2 + $0x2f8] sm:$0xff]  ;;  %v2083_v10 = vld [vmem:[#allocation2 + $0x330] sm:$0xff] }
 0x4a0   : > { %v3773_v9 = vpack.c.bf16 %v1977_v8, %v1976_v7  ;;  %v3782_v12 = vpack.c.bf16 %v2084_v11, %v2083_v10  ;;  %v2333_v8 = vld [vmem:[#allocation2 + $0x3c8] sm:$0xff]  ;;  %v2335_v11 = vld [vmem:[#allocation2 + $0x3d8] sm:$0xff] }
 0x4a1   : > { %v1474_v18 = vadd.f32 %v3116_v14, %v1468_v15  ;;  %v2086_v14 = vld [vmem:[#allocation2 + $0x348] sm:$0xff] }
 0x4a2   : > { %v4154_v22 = vpop.f32.mrb[10].mxu1  ;;  %v3785_v15 = vpack.c.bf16 %v2086_v14, %v2085_v13  ;;  %v2337_v14 = vld [vmem:[#allocation2 + $0x3e8] sm:$0xff] }
 0x4a3   : > { %v3492_v23 = vpop.f32.mrb[11].mxu1  ;;  %3464 = vmatmul.mubr.msk.f32.vlgmr.msra.gmra.mrb[8].mxu0 %vm654_vm6, %v1474_v18 }
 0x4a4   : > { %3741 = vmatpush3.bf16.msra.mxu0 %v3740_v16  ;;  %3474 = vmatprep.mubr.msk.f32.mxu0 %vm3944_vm0, %v3943_v0  ;;  %v2087_v16 = vld [vmem:[#allocation2 + $0x350] sm:$0xff] }
 0x4a5   : > { %3742 = vmatprep.subr.bf16.mxu0 %v3945_v1  ;;  %v3788_v18 = vpack.c.bf16 %v2088_v17, %v2087_v16  ;;  %v2497_v17 = vld [vmem:[#allocation2 + $0x420] sm:$0xff] }
 0x4a8   : > { %3744 = vmatpush3.bf16.msra.mxu0 %v3743_v24  ;;  %v3124_v24 = vld [vmem:[#allocation2 + $0x300] ss:$0 sm:$0xff] }
 0x4a9   : > { %3477 = vmatprep.subr.mxu0 %v3943_v0 }
 0x4ab   : > { %3475 = vmatmul.mubr.msk.f32.vlgmr.msra.gmra.mrb[8].mxu0 %vm654_vm6, %v1061_v27  ;;  %v3125_v27 = vld [vmem:[#allocation2 + $0x310] ss:$0 sm:$0xff] }
 0x4ac   : > { %3479 = vmatprep.mubr.msk.f32.mxu0 %vm3944_vm0, %v3943_v0 }
 0x57e   : > { %v1625_v32 = vpop.f32.mrb[8].mxu0 }
 0x57f   : > { %v3476_v33 = vpop.f32.mrb[9].mxu0  ;;  %3478 = vmatpush3.msra.mxu0 %v1625_v32 }
 0x580   : > { %3480 = vmatmul.mubr.msk.f32.vlgmr.msra.gmra.mrb[10].mxu0 %vm1631_vm9, %v1629_v30  ;;  %3751 = vmatprep.subr.bf16.mxu0 %v3945_v1 }
 0x581   : > { %3753 = vmatpush3.bf16.msra.mxu0 %v3752_v31  ;;  %3509 = vmatprep.mubr.msk.f32.mxu0 %vm3944_vm0, %v3943_v0 }
 0x582   : > { %3754 = vmatprep.subr.bf16.mxu0 %v3945_v1 }
 0x585   : > { %3756 = vmatpush3.bf16.msra.mxu0 %v3755_v36  ;;  %v2091_v36 = vld [vmem:[#allocation2 + $0x370] sm:$0xff] }
 0x586   : > { %3757 = vmatprep.subr.bf16.mxu0 %v3945_v1 }
 0x589   : > { %3759 = vmatpush3.bf16.msra.mxu0 %v3758_v39  ;;  %v3776_v39 = vpack.c.bf16 %v2092_v37, %v2091_v36  ;;  %v3138_v36 = vld [vmem:[#allocation2 + $0x418] ss:$0 sm:$0xff] }
 0x58a   : > { %3760 = vmatprep.subr.bf16.mxu0 %v3945_v1 }
 0x58d   : > { %3762 = vmatpush3.bf16.msra.mxu0 %v3761_v42 }
 0x58e   : > { %3775 = vmatprep.subr.bf16.mxu0 %v3945_v1 }
 0x653   : > { %v1701_v47 = vpop.f32.mrb[10].mxu0 }
 0x654   : > { %v1702_v48 = vadd.f32 %v1701_v47, %v1630_v46  ;;  %v3481_v49 = vpop.f32.mrb[11].mxu0 }
 0x656   : > { %v1705_v50 = vmax.f32 %v1702_v48, 0.0 }
 0x658   : > { %v1706_v52 = vadd.f32 %v1705_v50, %v1625_v32 }
 0x65a   : > { %v1708_v54 = vmul.f32 %v1707_v51, %v1706_v52 }
 0x65c   : > { %v1710_v55 = vadd.f32 %v1709_v53, %v1708_v54  ;;  %v3133_v54 = vld [vmem:[#allocation2 + $0x390] ss:$0 sm:$0xff] }
 0x65e   : > { %3510 = vmatmul.mubr.msk.f32.vlgmr.msra.gmra.mrb[12].mxu0 %vm1797_vm10, %v1710_v55 }
 0x65f   : > { %3542 = vmatprep.mubr.msk.f32.mxu0 %vm3944_vm0, %v3943_v0  ;;  %3777 = vmatpush3.bf16.msra.mxu0 %v3776_v39  ;;  %v2593_v39 = vld [vmem:[#allocation2 + $0x440] sm:$0xff] }
 0x660   : > { %3778 = vmatprep.subr.bf16.mxu0 %v3945_v1 }
 0x663   : > { %3780 = vmatpush3.bf16.msra.mxu0 %v3779_v41 }
 0x664   : > { %3564 = vmatprep.subr.mxu0 %v3943_v0 }
 0x731   : > { %v1867_v60 = vpop.f32.mrb[12].mxu0 }
 0x732   : > { %v1868_v62 = vadd.f32 %v1867_v60, %v4154_v22  ;;  %v3511_v63 = vpop.f32.mrb[13].mxu0  ;;  %v3129_v22 = vld [vmem:[#allocation2 + $0x318] ss:$0 sm:$0xff] }
 0x733   : > { %2069 = vrot.lane.b32.xlu0 %v3129_v22, %s3947_s29  ;;  %v2341_v63 = vld [vmem:[#allocation2 + $0x408] sm:$0xff] }
 0x734   : > { %v1876_v4 = vadd.f32 %v3122_v61, %v1868_v62  ;;  %v3134_v61 = vld [vmem:[%s4272_s5 + $0x8] sm:$0xff]  ;;  %v3797_v3 = vpack.c.bf16 %v2342_v2, %v2341_v63  ;;  %v3140_v63 = vld [vmem:[#allocation2 + $0x460] ss:$0 sm:$0xff] }
 0x736   : > { %v1877_v6 = vmax.f32 %v1876_v4, 0.0  ;;  %v2331_v4 = vld [vmem:[#allocation2 + $0x3b8] sm:$0xff] }
 0x738   : > { %3521 = vmatmul.mubr.msk.f32.vlgmr.msra.gmra.mrb[12].mxu1 %vm654_vm6, %v1877_v6 }
 0x739   : > { %3771 = vmatpush3.bf16.msra.mxu1 %v3770_v5  ;;  %3531 = vmatprep.mubr.msk.f32.mxu1 %vm3944_vm0, %v3943_v0  ;;  %v2332_v5 = vld [vmem:[#allocation2 + $0x3c0] sm:$0xff] }
 0x73a   : > { %3772 = vmatprep.subr.bf16.mxu1 %v3945_v1 }
 0x73d   : > { %3774 = vmatpush3.bf16.msra.mxu1 %v3773_v9  ;;  %v2334_v9 = vld [vmem:[#allocation2 + $0x3d0] sm:$0xff] }
 0x73e   : > { %3781 = vmatprep.subr.bf16.mxu1 %v3945_v1  ;;  %v3803_v10 = vpack.c.bf16 %v2334_v9, %v2333_v8 }
 0x740   : > { %3532 = vmatmul.mubr.msk.f32.vlgmr.msra.gmra.mrb[14].mxu1 %vm654_vm6, %v1877_v6  ;;  %v3800_v6 = vpack.c.bf16 %v2332_v5, %v2331_v4  ;;  %v3141_v4 = vld [vmem:[#allocation2 + $0x470] ss:$0 sm:$0xff] }
 0x741   : > { %3783 = vmatpush3.bf16.msra.mxu1 %v3782_v12  ;;  %3561 = vmatprep.mubr.msk.f32.mxu1 %vm3944_vm0, %v3943_v0  ;;  %v2336_v12 = vld [vmem:[#allocation2 + $0x3e0] sm:$0xff] }
 0x742   : > { %3784 = vmatprep.subr.bf16.mxu1 %v3945_v1  ;;  %v3806_v13 = vpack.c.bf16 %v2336_v12, %v2335_v11  ;;  %v3145_v11 = vld [vmem:[#allocation2 + $0x478] ss:$0 sm:$0xff]  ;;  %v2710_v12 = vld [vmem:[#allocation2 + $0x4d0] sm:$0xff] }
 0x745   : > { %3786 = vmatpush3.bf16.msra.mxu1 %v3785_v15  ;;  %v2338_v15 = vld [vmem:[#allocation2 + $0x3f0] sm:$0xff] }
 0x746   : > { %3787 = vmatprep.subr.bf16.mxu1 %v3945_v1  ;;  %v3809_v16 = vpack.c.bf16 %v2338_v15, %v2337_v14  ;;  %v2712_v14 = vld [vmem:[#allocation2 + $0x4e0] sm:$0xff] }
 0x749   : > { %3789 = vmatpush3.bf16.msra.mxu1 %v3788_v18  ;;  %v2498_v18 = vld [vmem:[#allocation2 + $0x428] sm:$0xff] }
 0x74a   : > { %3790 = vmatprep.subr.bf16.mxu1 %v3945_v1  ;;  %v3812_v19 = vpack.c.bf16 %v2498_v18, %v2497_v17 }
 0x74d   : > { %3792 = vmatpush3.bf16.msra.mxu1 %v3791_v21 }
 0x74e   : > { %3811 = vmatprep.subr.bf16.mxu1 %v3945_v1 }
 0x7a5   : > { %v2070_v45 = vpop.permute.xlu0 %2069 }
 0x80b   : > { %v1951_v23 = vpop.f32.mrb[12].mxu1 }
 0x80c   : > { %v1955_v25 = vadd.f32 %v1951_v23, %v1710_v55  ;;  %v3522_v26 = vpop.f32.mrb[13].mxu1  ;;  %v2339_v55 = vld [vmem:[#allocation2 + $0x3f8] sm:$0xff] }
 0x80d   : > { %v3794_v62 = vpack.c.bf16 %v2340_v56, %v2339_v55  ;;  %v2708_v56 = vld [vmem:[#allocation2 + $0x4c0] sm:$0xff] }
 0x80e   : > { %v1961_v28 = vadd.f32 %v3124_v24, %v1955_v25  ;;  %v2327_v25 = vld [vmem:[#allocation2 + $0x3a8] sm:$0xff] }
 0x810   : > { %v1967_v30 = vmul.f32 %v3125_v27, %v1961_v28  ;;  %v2329_v27 = vld [vmem:[#allocation2 + $0x3b0] sm:$0xff] }
 0x812   : > { %v1973_v31 = vadd.f32 %v3126_v29, %v1967_v30 }
 0x813   : > { %v2044_v32 = vpop.f32.mrb[14].mxu1 }
 0x814   : > { %2049 = vrot.lane.b32.xlu1 %v2044_v32, %s3947_s29  ;;  %v3533_v33 = vpop.f32.mrb[15].mxu1  ;;  %3562 = vmatmul.mubr.msk.f32.vlgmr.msra.gmra.mrb[16].mxu1 %vm1797_vm10, %v1973_v31  ;;  %v2499_v32 = vld [vmem:[#allocation2 + $0x430] sm:$0xff] }
 0x815   : > { %3607 = vmatprep.mubr.msk.f32.mxu1 %vm3944_vm0, %v3943_v0  ;;  %3813 = vmatpush3.bf16.msra.mxu1 %v3812_v19  ;;  %v2500_v33 = vld [vmem:[#allocation2 + $0x438] sm:$0xff] }
 0x816   : > { %3814 = vmatprep.subr.bf16.mxu1 %v3945_v1 }
 0x818   : > { %2059 = vrot.lane.b32.xlu1 %v3128_v34, %s3947_s29  ;;  %v3815_v34 = vpack.c.bf16 %v2500_v33, %v2499_v32  ;;  %v2871_v32 = vld [vmem:[#allocation2 + $0x510] sm:$0xff] }
 0x81a   : > { %3816 = vmatpush3.bf16.msra.mxu1 %v3815_v34 }
 0x81b   : > { %3817 = vmatprep.subr.bf16.mxu1 %v3945_v1 }
 0x81c   : > { %2079 = vrot.lane.b32.xlu1 %v3130_v35, %s3947_s29 }
 0x820   : > { %2343 = vrot.lane.b32.xlu1 %v4087_v58, %s3948_s11 }
 0x886   : > { %v2050_v42 = vpop.permute.xlu1 %2049 }
 0x887   : > { %v2052_v43 = vadd.f32 %v2050_v42, %v4087_v58  ;;  %v3818_v42 = vpack.c.bf16 %v2594_v40, %v2593_v39 }
 0x88a   : > { %v2060_v44 = vpop.permute.xlu1 %2059 }
 0x88b   : > { %v2062_v46 = vadd.f32 %v2060_v44, %v2052_v43  ;;  %v2595_v44 = vld [vmem:[#allocation2 + $0x450] sm:$0xff] }
 0x88d   : > { %v2072_v47 = vmul.f32 %v2070_v45, %v2062_v46  ;;  %v2596_v45 = vld [vmem:[#allocation2 + $0x458] sm:$0xff] }
 0x88e   : > { %v2080_v48 = vpop.permute.xlu1 %2079  ;;  %v3821_v46 = vpack.c.bf16 %v2596_v45, %v2595_v44  ;;  %v3150_v44 = vld [vmem:[#allocation2 + $0x538] ss:$0 sm:$0xff] }
 0x88f   : > { %v2082_v49 = vadd.f32 %v2080_v48, %v2072_v47  ;;  %v2702_v47 = vld [vmem:[#allocation2 + $0x490] sm:$0xff]  ;;  %v2703_v48 = vld [vmem:[#allocation2 + $0x498] sm:$0xff] }
 0x891   : > { %2096 = vrot.lane.b32.xlu0 %v2082_v49, %s3947_s29  ;;  %v3830_v49 = vpack.c.bf16 %v2703_v48, %v2702_v47 }
 0x892   : > { %v2344_v7 = vpop.permute.xlu1 %2343 }
 0x8e7   : > { %v2239_v50 = vpop.f32.mrb[16].mxu1 }
 0x8e8   : > { %v3563_v51 = vpop.f32.mrb[17].mxu1 }
 0x8e9   : > { %v2705_v51 = vld [vmem:[#allocation2 + $0x4a8] sm:$0xff] }
 0x903   : > { %v2097_v52 = vpop.permute.xlu0 %2096 }
 0x904   : > { %3543 = vmatmul.mubr.msk.f32.vlgmr.msra.gmra.mrb[14].mxu0 %vm654_vm6, %v2097_v52 }
 0x905   : > { %3566 = vmatprep.mubr.msk.f32.mxu0 %vm3944_vm0, %v3943_v0 }
 0x9d7   : > { %v2166_v53 = vpop.f32.mrb[14].mxu0 }
 0x9d8   : > { %v2240_v57 = vadd.f32 %v2239_v50, %v2166_v53  ;;  %v3544_v59 = vpop.f32.mrb[15].mxu0  ;;  %v2704_v50 = vld [vmem:[#allocation2 + $0x4a0] sm:$0xff]  ;;  %v2706_v53 = vld [vmem:[#allocation2 + $0x4b0] sm:$0xff] }
 0x9d9   : > { %v3833_v52 = vpack.c.bf16 %v2705_v51, %v2704_v50 }
 0x9da   : > { %v2248_v60 = vadd.f32 %v3133_v54, %v2240_v57  ;;  %v2707_v54 = vld [vmem:[#allocation2 + $0x4b8] sm:$0xff]  ;;  %v2709_v57 = vld [vmem:[#allocation2 + $0x4c8] sm:$0xff] }
 0x9db   : > { %v3836_v55 = vpack.c.bf16 %v2707_v54, %v2706_v53  ;;  %v3839_v59 = vpack.c.bf16 %v2709_v57, %v2708_v56  ;;  %v3152_v57 = vld [vmem:[#allocation2 + $0x540] ss:$0 sm:$0xff] }
 0x9dc   : > { %3565 = vmatpush3.msra.mxu0 %v2248_v60 }
 0x9dd   : > { %3567 = vmatmul.mubr.msk.f32.vlgmr.msra.gmra.mrb[16].mxu0 %vm1631_vm9, %v3134_v61  ;;  %3793 = vmatprep.subr.bf16.mxu0 %v3945_v1  ;;  %v3146_v61 = vld [vmem:[#allocation2 + $0x488] ss:$0 sm:$0xff] }
 0x9de   : > { %3795 = vmatpush3.bf16.msra.mxu0 %v3794_v62  ;;  %3577 = vmatprep.mubr.msk.f32.mxu0 %vm3944_vm0, %v3943_v0 }
 0x9df   : > { %3796 = vmatprep.subr.bf16.mxu0 %v3945_v1 }
 0x9e2   : > { %3798 = vmatpush3.bf16.msra.mxu0 %v3797_v3 }
 0x9e3   : > { %3799 = vmatprep.subr.bf16.mxu0 %v3945_v1 }
 0x9e5   : > { %3578 = vmatmul.mubr.msk.f32.vlgmr.msra.gmra.mrb[18].mxu0 %vm654_vm6, %v2344_v7 }
 0x9e6   : > { %3801 = vmatpush3.bf16.msra.mxu0 %v3800_v6  ;;  %3596 = vmatprep.mubr.msk.f32.mxu0 %vm3944_vm0, %v3943_v0  ;;  %v3142_v6 = vld [vmem:[#allocation2 + $0x480] ss:$0 sm:$0xff] }
 0x9e7   : > { %3802 = vmatprep.subr.bf16.mxu0 %v3945_v1 }
 0x9ea   : > { %3804 = vmatpush3.bf16.msra.mxu0 %v3803_v10 }
 0x9eb   : > { %3805 = vmatprep.subr.bf16.mxu0 %v3945_v1 }
 0x9ee   : > { %3807 = vmatpush3.bf16.msra.mxu0 %v3806_v13  ;;  %v2711_v13 = vld [vmem:[#allocation2 + $0x4d8] sm:$0xff] }
 0x9ef   : > { %3808 = vmatprep.subr.bf16.mxu0 %v3945_v1  ;;  %v3824_v15 = vpack.c.bf16 %v2711_v13, %v2710_v12 }
 0x9f2   : > { %3810 = vmatpush3.bf16.msra.mxu0 %v3809_v16  ;;  %v2713_v16 = vld [vmem:[#allocation2 + $0x4e8] sm:$0xff] }
 0x9f3   : > { %3823 = vmatprep.subr.bf16.mxu0 %v3945_v1  ;;  %v3827_v17 = vpack.c.bf16 %v2713_v16, %v2712_v14 }
 0xab0   : > { %v2321_v21 = vpop.f32.mrb[16].mxu0 }
 0xab1   : > { %v2322_v22 = vadd.f32 %v2321_v21, %v2251_v20  ;;  %v3568_v23 = vpop.f32.mrb[17].mxu0 }
 0xab3   : > { %v2325_v24 = vmax.f32 %v2322_v22, 0.0 }
 0xab5   : > { %v2326_v26 = vadd.f32 %v2325_v24, %v2248_v60  ;;  %v3144_v60 = vld [vmem:[#allocation2 + $0x468] ss:$0 sm:$0xff] }
 0xab6   : > { %2678 = vrot.lane.b32.xlu1 %v3144_v60, %s3946_s22  ;;  %v3153_v60 = vld [vmem:[#allocation2 + $0x548] ss:$0 sm:$0xff] }
 0xab7   : > { %v2328_v28 = vmul.f32 %v2327_v25, %v2326_v26 }
 0xab8   : > { %v2413_v29 = vpop.f32.mrb[18].mxu0 }
 0xab9   : > { %v2330_v30 = vadd.f32 %v2329_v27, %v2328_v28  ;;  %v3579_v31 = vpop.f32.mrb[19].mxu0  ;;  %v2868_v28 = vld [vmem:[#allocation2 + $0x4f8] sm:$0xff] }
 0xaba   : > { %2698 = vrot.lane.b32.xlu1 %v3146_v61, %s3946_s22  ;;  %v2870_v31 = vld [vmem:[#allocation2 + $0x508] sm:$0xff] }
 0xabb   : > { %3597 = vmatmul.mubr.msk.f32.vlgmr.msra.gmra.mrb[20].mxu0 %vm1797_vm10, %v2330_v30  ;;  %v3845_v34 = vpack.c.bf16 %v2871_v32, %v2870_v31 }
 0xabc   : > { %3629 = vmatprep.mubr.msk.f32.mxu0 %vm3944_vm0, %v3943_v0  ;;  %3825 = vmatpush3.bf16.msra.mxu0 %v3824_v15 }
 0xabd   : > { %3826 = vmatprep.subr.bf16.mxu0 %v3945_v1 }
 0xac0   : > { %3828 = vmatpush3.bf16.msra.mxu0 %v3827_v17 }
 0xac1   : > { %3841 = vmatprep.subr.bf16.mxu0 %v3945_v1 }
 0xb28   : > { %v2679_v18 = vpop.permute.xlu1 %2678 }
 0xb2c   : > { %v2699_v23 = vpop.permute.xlu1 %2698 }
 0xb8e   : > { %v2486_v35 = vpop.f32.mrb[20].mxu0 }
 0xb8f   : > { %v2487_v37 = vadd.f32 %v2486_v35, %v2413_v29  ;;  %v3598_v38 = vpop.f32.mrb[21].mxu0  ;;  %v2869_v29 = vld [vmem:[#allocation2 + $0x500] sm:$0xff] }
 0xb90   : > { %v2873_v35 = vld [vmem:[#allocation2 + $0x520] sm:$0xff]  ;;  %v2875_v38 = vld [vmem:[#allocation2 + $0x530] sm:$0xff] }
 0xb91   : > { %v2495_v41 = vadd.f32 %v3138_v36, %v2487_v37  ;;  %v2874_v37 = vld [vmem:[#allocation2 + $0x528] sm:$0xff] }
 0xb92   : > { %v3851_v39 = vpack.c.bf16 %v2875_v38, %v2874_v37 }
 0xb93   : > { %v2496_v43 = vmax.f32 %v2495_v41, 0.0  ;;  %v3149_v41 = vld [vmem:[#allocation2 + $0x4f0] ss:$0 sm:$0xff] }
 0xb95   : > { %3608 = vmatmul.mubr.msk.f32.vlgmr.msra.gmra.mrb[18].mxu1 %vm654_vm6, %v2496_v43 }
 0xb96   : > { %3819 = vmatpush3.bf16.msra.mxu1 %v3818_v42  ;;  %3618 = vmatprep.mubr.msk.f32.mxu1 %vm3944_vm0, %v3943_v0 }
 0xb97   : > { %3820 = vmatprep.subr.bf16.mxu1 %v3945_v1 }
 0xb9a   : > { %3822 = vmatpush3.bf16.msra.mxu1 %v3821_v46 }
 0xb9b   : > { %3829 = vmatprep.subr.bf16.mxu1 %v3945_v1 }
 0xb9d   : > { %3619 = vmatmul.mubr.msk.f32.vlgmr.msra.gmra.mrb[20].mxu1 %vm654_vm6, %v2496_v43 }
 0xb9e   : > { %3831 = vmatpush3.bf16.msra.mxu1 %v3830_v49  ;;  %3648 = vmatprep.mubr.msk.f32.mxu1 %vm3944_vm0, %v3943_v0 }
 0xb9f   : > { %3832 = vmatprep.subr.bf16.mxu1 %v3945_v1 }
 0xba2   : > { %3834 = vmatpush3.bf16.msra.mxu1 %v3833_v52 }
 0xba3   : > { %3835 = vmatprep.subr.bf16.mxu1 %v3945_v1 }
 0xba6   : > { %3837 = vmatpush3.bf16.msra.mxu1 %v3836_v55 }
 0xba7   : > { %3838 = vmatprep.subr.bf16.mxu1 %v3945_v1 }
 0xbaa   : > { %3840 = vmatpush3.bf16.msra.mxu1 %v3839_v59 }
 0xc68   : > { %v2570_v62 = vpop.f32.mrb[18].mxu1 }
 0xc69   : > { %v2574_v2 = vadd.f32 %v2570_v62, %v2330_v30  ;;  %v3609_v3 = vpop.f32.mrb[19].mxu1  ;;  %v3842_v30 = vpack.c.bf16 %v2869_v29, %v2868_v28 }
 0xc6b   : > { %v2580_v5 = vadd.f32 %v3140_v63, %v2574_v2 }
 0xc6d   : > { %v2586_v7 = vmul.f32 %v3141_v4, %v2580_v5 }
 0xc6f   : > { %v2592_v8 = vadd.f32 %v3142_v6, %v2586_v7 }
 0xc70   : > { %v2663_v9 = vpop.f32.mrb[20].mxu1 }
 0xc71   : > { %2668 = vrot.lane.b32.xlu0 %v2663_v9, %s3946_s22  ;;  %v3620_v10 = vpop.f32.mrb[21].mxu1  ;;  %3649 = vmatmul.mubr.msk.f32.vlgmr.msra.gmra.mrb[22].mxu1 %vm1797_vm10, %v2592_v8 }
 0xc75   : > { %2688 = vrot.lane.b32.xlu0 %v3145_v11, %s3946_s22 }
 0xce3   : > { %v2669_v19 = vpop.permute.xlu0 %2668 }
 0xce4   : > { %v2671_v20 = vadd.f32 %v2669_v19, %v4087_v58  ;;  %v2872_v58 = vld [vmem:[#allocation2 + $0x518] sm:$0xff] }
 0xce5   : > { %v3848_v36 = vpack.c.bf16 %v2873_v35, %v2872_v58 }
 0xce6   : > { %v2681_v21 = vadd.f32 %v2679_v18, %v2671_v20 }
 0xce7   : > { %v2689_v22 = vpop.permute.xlu0 %2688 }
 0xce8   : > { %v2691_v24 = vmul.f32 %v2689_v22, %v2681_v21 }
 0xcea   : > { %v2701_v25 = vadd.f32 %v2699_v23, %v2691_v24 }
 0xcec   : > { %2715 = vrot.lane.b32.xlu0 %v2701_v25, %s3948_s11 }
 0xd44   : > { %v2858_v26 = vpop.f32.mrb[22].mxu1 }
 0xd45   : > { %v3650_v27 = vpop.f32.mrb[23].mxu1 }
 0xd5e   : > { %v2716_v33 = vpop.permute.xlu0 %2715 }
 0xd5f   : > { %3630 = vmatmul.mubr.msk.f32.vlgmr.msra.gmra.mrb[22].mxu0 %vm654_vm6, %v2716_v33 }
 0xd60   : > { %3843 = vmatpush3.bf16.msra.mxu0 %v3842_v30  ;;  %3667 = vmatprep.mubr.msk.f32.mxu0 %vm3944_vm0, %v3943_v0 }
 0xd61   : > { %3844 = vmatprep.subr.bf16.mxu0 %v3945_v1 }
 0xd64   : > { %3846 = vmatpush3.bf16.msra.mxu0 %v3845_v34 }
 0xd65   : > { %3847 = vmatprep.subr.bf16.mxu0 %v3945_v1 }
 0xd68   : > { %3849 = vmatpush3.bf16.msra.mxu0 %v3848_v36 }
 0xd69   : > { %3850 = vmatprep.subr.bf16.mxu0 %v3945_v1 }
 0xd6c   : > { %3852 = vmatpush3.bf16.msra.mxu0 %v3851_v39 }
 0xe32   : > { %v2785_v40 = vpop.f32.mrb[22].mxu0 }
 0xe33   : > { %v2859_v42 = vadd.f32 %v2858_v26, %v2785_v40  ;;  %v3631_v43 = vpop.f32.mrb[23].mxu0 }
 0xe35   : > { %v2867_v0 = vadd.f32 %v3149_v41, %v2859_v42 }
 0xe37   : > { %3668 = vmatmul.mubr.msk.f32.vlgmr.msra.gmra.mrb[24].mxu0 %vm1797_vm10, %v2867_v0 }
 0xf0a   : > { %v2950_v45 = vpop.f32.mrb[24].mxu0 }
 0xf0b   : > { %v2951_v46 = vadd.f32 %v3150_v44, %v2950_v45  ;;  %v3669_v47 = vpop.f32.mrb[25].mxu0 }
 0xf0d   : > { %v2955_v48 = vsel %vm2954_vm11, %v2951_v46, 0.0 }
 0xf0e   : > { %2956 = vadd.xlane.f32.xlu1 %v2955_v48 }
 0xf9b   : > { %v2957_v1 = vpop.xlane.xlu1 %2956 }
 0xf9c   : > { %v2959_v49 = vmul.f32 0.16666667, %v2957_v1 }
 0xf9e   : > { %v2960_v50 = vsub.f32 %v2951_v46, %v2959_v49 }
 0xfa0   : > { %v2961_v51 = vmul.f32 %v2960_v50, %v2960_v50 }
 0xfa2   : > { %v2962_v52 = vsel %vm2954_vm11, %v2961_v51, 0.0 }
 0xfa3   : > { %2963 = vadd.xlane.f32.xlu0 %v2962_v52 }
0x1030   : > { %v2964_v53 = vpop.xlane.xlu0 %2963 }
0x1031   : > { %v2965_v54 = vmul.f32 0.16666667, %v2964_v53 }
0x1033   : > { %v2966_v55 = vadd.f32 1e-05, %v2965_v54 }
0x1035   : > { %3898 = vrsqrt.f32 %v2966_v55 }
0x103f   : > { %v3899_v56 = vpop.eup %3898 }
0x1040   : > { %v2968_v59 = vmul.f32 %v3899_v56, %v2960_v50 }
0x1042   : > { %v2974_v61 = vmul.f32 %v3152_v57, %v2968_v59 }
0x1044   : > { %v2980_v62 = vadd.f32 %v3153_v60, %v2974_v61 }
0x1046   : > { %2981 = vst.msk [vmem:[%s300_s17] sm:$0xff] %vm2954_vm11, %v2980_v62 }
0x1047 PF: > { %s17_s21 = sadd.s32 1, %s3938_s21  }
0x1048   : > { %p14_p5 = scmp.ge.s32.totalorder %s17_s21, 4  }
0x104a   :  { %16 = sbr.rel (!%p14_p5) target bundleno = 1 (0x1), region = 86 }
0x1051   :  { %3001 = vsyncpa [#allocation3], 1 }
0x1052   :  { %3003 = vsyncpa [#allocation3 + $0x1], 1 }

</bundles_post_ra>
